<compile_context>
chip_gen: v7x
topology: tpu7x:2x2x1
jax: 0.10.0
libtpu: 0.0.40
codegen_flags: <defaults>
</compile_context>

<pallas_src>
import functools

import jax
import jax.numpy as jnp
from jax import lax
from jax.experimental import pallas as pl
from jax.experimental.pallas import tpu as pltpu


def _round_up(x, m):
    return ((x + m - 1) // m) * m


def _pick_row_tile(rows):
    for cand in (1024, 512, 256, 128, 64, 32, 16, 8):
        if cand <= rows and rows % cand == 0:
            return cand
    return rows  # small: single full block


def _conv_stats_kernel(a_ref, b_ref, y_ref, stats_ref, acc_ref):
    """Grid (M-tiles, K-tiles): accumulate bf16 matmuls into an f32 accumulator;
    on the last K step emit the bf16 y tile + per-tile channel sum / ssq."""
    @pl.when(pl.program_id(1) == 0)
    def _init():
        acc_ref[...] = jnp.zeros_like(acc_ref)

    acc_ref[...] += jnp.dot(a_ref[...], b_ref[...],
                            preferred_element_type=jnp.float32)

    @pl.when(pl.program_id(1) == pl.num_programs(1) - 1)
    def _finalize():
        y = acc_ref[...]                             # f32, pre-cast statistics
        y_ref[...] = y.astype(y_ref.dtype)           # bf16 intermediate to HBM
        s = jnp.sum(y, axis=0, keepdims=True)        # (1, C_out)
        q = jnp.sum(y * y, axis=0, keepdims=True)    # (1, C_out)
        stats_ref[...] = jnp.concatenate([s, q], axis=0)   # (2, C_out) partials


def _bn_act_kernel(y_ref, scale_ref, shift_ref, o_ref):
    """Fused affine batch-norm (folded scale/shift) + LeakyReLU(0.1), f32 VPU math."""
    z = y_ref[...].astype(jnp.float32) * scale_ref[...] + shift_ref[...]
    o_ref[...] = jnp.where(z >= 0, z, 0.1 * z).astype(o_ref.dtype)


@functools.partial(jax.jit,
                   static_argnames=("stride", "padding", "tile_m", "tile_k_max"))
def cnn_block_forward(x_nchw, weight, gamma, beta, *, stride=1, padding=1,
                      eps=1e-5, tile_m=512, tile_k_max=1024):
    N, C_in, H, W = x_nchw.shape
    C_out, _, KH, KW = weight.shape
    H_out = (H + 2 * padding - KH) // stride + 1
    W_out = (W + 2 * padding - KW) // stride + 1
    M = N * H_out * W_out
    K = KH * KW * C_in

    # ---- glue: im2col (NCHW -> flattened NHWC patches), bf16 matmul operands ----
    x = jnp.transpose(x_nchw, (0, 2, 3, 1)).astype(jnp.bfloat16)
    xp = jnp.pad(x, ((0, 0), (padding, padding), (padding, padding), (0, 0)))
    cols = []
    for dy in range(KH):
        for dx in range(KW):
            cols.append(xp[:, dy:dy + stride * H_out:stride,
                            dx:dx + stride * W_out:stride, :])
    A = jnp.concatenate(cols, axis=-1).reshape(M, K)
    # PyTorch weight is (C_out, C_in, KH, KW); patch features ordered (dy, dx, c_in).
    B = jnp.transpose(weight, (2, 3, 1, 0)).reshape(K, C_out).astype(jnp.bfloat16)

    # ---- K tiling (bounds VMEM; zero-padded columns contribute nothing) ----
    K_pad8 = _round_up(K, 8)
    if K_pad8 > tile_k_max:
        tile_k = tile_k_max                      # multiple of 128 -> valid block dim
        K_pad = _round_up(K, tile_k)
    else:
        tile_k = K_pad8                          # single K block, full-dim block
        K_pad = K_pad8
    A = jnp.pad(A, ((0, 0), (0, K_pad - K)))
    B = jnp.pad(B, ((0, K_pad - K), (0, 0)))

    # ---- M tiling (zero-padded rows give zero y rows and zero stats) ----
    tile_m = min(tile_m, _round_up(M, 8))
    M_pad = _round_up(M, tile_m)
    A = jnp.pad(A, ((0, M_pad - M), (0, 0)))
    G = M_pad // tile_m
    KG = K_pad // tile_k

    # ---- kernel 1: conv matmul + per-tile batch statistics ----
    y, stats = pl.pallas_call(
        _conv_stats_kernel,
        out_shape=(jax.ShapeDtypeStruct((M_pad, C_out), jnp.bfloat16),
                   jax.ShapeDtypeStruct((G, 2, C_out), jnp.float32)),
        grid_spec=pltpu.PrefetchScalarGridSpec(
            num_scalar_prefetch=0,
            grid=(G, KG),
            in_specs=[pl.BlockSpec((tile_m, tile_k), lambda i, k: (i, k)),
                      pl.BlockSpec((tile_k, C_out), lambda i, k: (k, 0))],
            out_specs=(pl.BlockSpec((tile_m, C_out), lambda i, k: (i, 0)),
                       pl.BlockSpec((None, 2, C_out), lambda i, k: (i, 0, 0))),
            scratch_shapes=[pltpu.VMEM((tile_m, C_out), jnp.float32)]),
        compiler_params=pltpu.CompilerParams(
            dimension_semantics=("parallel", "arbitrary")),
    )(A, B)

    # ---- glue: reduce tiny per-tile partials, fold BN into scale/shift ----
    sums = jnp.sum(stats[:, 0, :], axis=0).reshape(1, C_out)
    ssq = jnp.sum(stats[:, 1, :], axis=0).reshape(1, C_out)
    mean = sums / M
    var = jnp.maximum(ssq / M - mean * mean, 0.0)    # biased var (BN training norm)
    scale = (gamma.reshape(1, C_out) / jnp.sqrt(var + eps)).astype(jnp.float32)
    shift = (beta.reshape(1, C_out) - mean * scale).astype(jnp.float32)

    # ---- lane-dense view for the elementwise pass (128-wide unmasked stores) ----
    LANE = 128
    if C_out < LANE and LANE % C_out == 0 and (M_pad * C_out) % LANE == 0:
        rows, width = M_pad * C_out // LANE, LANE
        y2 = y.reshape(rows, width)
        scale2 = jnp.tile(scale, (1, LANE // C_out))
        shift2 = jnp.tile(shift, (1, LANE // C_out))
    else:
        rows, width = M_pad, C_out
        y2, scale2, shift2 = y, scale, shift
    tile_r = _pick_row_tile(rows)

    # ---- kernel 2: fused batch-norm (scale/shift) + LeakyReLU(0.1) ----
    out = pl.pallas_call(
        _bn_act_kernel,
        out_shape=jax.ShapeDtypeStruct((rows, width), jnp.float32),
        grid=(rows // tile_r,),
        in_specs=[pl.BlockSpec((tile_r, width), lambda i: (i, 0)),
                  pl.BlockSpec((1, width), lambda i: (0, 0)),
                  pl.BlockSpec((1, width), lambda i: (0, 0))],
        out_specs=pl.BlockSpec((tile_r, width), lambda i: (i, 0)),
        compiler_params=pltpu.CompilerParams(
            dimension_semantics=("parallel",)),
    )(y2, scale2, shift2)

    out = out.reshape(M_pad, C_out)[:M].reshape(N, H_out, W_out, C_out)
    return jnp.transpose(out, (0, 3, 1, 2))     # back to NCHW, like PyTorch


def reference_forward(x_nchw, weight, gamma, beta, *, stride=1, padding=1, eps=1e-5):
    """Pure-JAX f32 reference mirroring the PyTorch module (BN in training mode)."""
    y = lax.conv_general_dilated(
        x_nchw.astype(jnp.float32), weight.astype(jnp.float32),
        window_strides=(stride, stride),
        padding=((padding, padding), (padding, padding)),
        dimension_numbers=("NCHW", "OIHW", "NCHW"))
    mean = jnp.mean(y, axis=(0, 2, 3), keepdims=True)
    var = jnp.var(y, axis=(0, 2, 3), keepdims=True)
    yn = (y - mean) / jnp.sqrt(var + eps)
    yn = yn * gamma.reshape(1, -1, 1, 1) + beta.reshape(1, -1, 1, 1)
    return jnp.where(yn >= 0, yn, 0.1 * yn)


if __name__ == "__main__":
    key = jax.random.PRNGKey(0)
    kx, kw = jax.random.split(key)

    # CNNBlock(in_channel=4, out_channel=8, kernel_size=3, stride=1, padding=1)
    N, C_in, H, W = 2, 4, 16, 16
    C_out, KH, KW = 8, 3, 3

    x = jax.random.normal(kx, (N, C_in, H, W), dtype=jnp.float32)
    weight = jax.random.normal(kw, (C_out, C_in, KH, KW), dtype=jnp.float32) * 0.1
    gamma = jnp.ones((C_out,), jnp.float32)     # BatchNorm2d default affine init
    beta = jnp.zeros((C_out,), jnp.float32)

    out = cnn_block_forward(x, weight, gamma, beta, stride=1, padding=1)
    out = jax.block_until_ready(out)

    ref = reference_forward(x, weight, gamma, beta, stride=1, padding=1)
    assert out.shape == ref.shape, (out.shape, ref.shape)
    max_err = float(jnp.max(jnp.abs(out - ref)))
    # bf16 MXU operands + bf16 y intermediate vs. the all-f32 reference: expected
    # worst-case post-BN error ~1e-2, so validate at 3e-2.
    assert jnp.allclose(out, ref, atol=3e-2, rtol=3e-2), f"max abs err = {max_err}"

    print("KERNEL_OK")
</pallas_src>

<mosaic_0001>
module attributes {stable_mosaic.version = 11 : i64} {
  func.func @_conv_stats_kernel(%arg0: i32, %arg1: i32, %arg2: memref<512x40xbf16, #tpu.memory_space<vmem>>, %arg3: memref<40x8xbf16, #tpu.memory_space<vmem>>, %arg4: memref<512x8xbf16, #tpu.memory_space<vmem>>, %arg5: memref<1x2x8xf32, #tpu.memory_space<vmem>>, %arg6: memref<512x8xf32, #tpu.memory_space<vmem>>) attributes {dimension_semantics = [#tpu.dimension_semantics<parallel>, #tpu.dimension_semantics<arbitrary>], iteration_bounds = array<i64: 1, 1>, scalar_prefetch = 0 : i64, scratch_operands = 1 : i64, tpu.core_type = #tpu.core_type<tc>, window_params = [{transform_indices = @transform_0, window_bounds = array<i64: 512, 40>}, {transform_indices = @transform_1, window_bounds = array<i64: 40, 8>}, {transform_indices = @transform_2, window_bounds = array<i64: 512, 8>}, {transform_indices = @transform_3, window_bounds = array<i64: 1, 2, 8>}]} {
    %c0_i32 = arith.constant 0 : i32
    %0 = arith.cmpi eq, %arg1, %c0_i32 : i32
    %1 = arith.extui %0 : i1 to i32
    %c0_i32_0 = arith.constant 0 : i32
    %2 = arith.cmpi ne, %1, %c0_i32_0 : i32
    scf.if %2 {
      %cst_10 = arith.constant 0.000000e+00 : f32
      %12 = vector.broadcast %cst_10 : f32 to vector<512x8xf32>
      %c0_11 = arith.constant 0 : index
      %c0_12 = arith.constant 0 : index
      %13 = vector.load %arg6[%c0_11, %c0_12] : memref<512x8xf32, #tpu.memory_space<vmem>>, vector<512x8xf32>
      tpu.vector_store %arg6[%c0_11, %c0_12], %12 {strides = array<i32>} : memref<512x8xf32, #tpu.memory_space<vmem>>, vector<512x8xf32>,
    } else {
    }
    %c0 = arith.constant 0 : index
    %c0_1 = arith.constant 0 : index
    %3 = vector.load %arg6[%c0, %c0_1] : memref<512x8xf32, #tpu.memory_space<vmem>>, vector<512x8xf32>
    %c0_2 = arith.constant 0 : index
    %c0_3 = arith.constant 0 : index
    %4 = vector.load %arg2[%c0_2, %c0_3] : memref<512x40xbf16, #tpu.memory_space<vmem>>, vector<512x40xbf16>
    %c0_4 = arith.constant 0 : index
    %c0_5 = arith.constant 0 : index
    %5 = vector.load %arg3[%c0_4, %c0_5] : memref<40x8xbf16, #tpu.memory_space<vmem>>, vector<40x8xbf16>
    %cst = arith.constant dense<0.000000e+00> : vector<512x8xf32>
    %6 = tpu.matmul %4, %5, %cst {dimension_numbers = #tpu.dot_dimension_numbers<[1], [0], [0], [1], [0, 0, 1, 1], [], []>} : vector<512x40xbf16>, vector<40x8xbf16>, vector<512x8xf32> -> vector<512x8xf32>
    %7 = arith.addf %3, %6 : vector<512x8xf32>
    %c0_6 = arith.constant 0 : index
    %c0_7 = arith.constant 0 : index
    %8 = vector.load %arg6[%c0_6, %c0_7] : memref<512x8xf32, #tpu.memory_space<vmem>>, vector<512x8xf32>
    tpu.vector_store %arg6[%c0_6, %c0_7], %7 {strides = array<i32>} : memref<512x8xf32, #tpu.memory_space<vmem>>, vector<512x8xf32>,
    %c0_i32_8 = arith.constant 0 : i32
    %9 = arith.cmpi eq, %arg1, %c0_i32_8 : i32
    %10 = arith.extui %9 : i1 to i32
    %c0_i32_9 = arith.constant 0 : i32
    %11 = arith.cmpi ne, %10, %c0_i32_9 : i32
    scf.if %11 {
      %c0_10 = arith.constant 0 : index
      %c0_11 = arith.constant 0 : index
      %12 = vector.load %arg6[%c0_10, %c0_11] : memref<512x8xf32, #tpu.memory_space<vmem>>, vector<512x8xf32>
      %13 = arith.truncf %12 : vector<512x8xf32> to vector<512x8xbf16>
      %c0_12 = arith.constant 0 : index
      %c0_13 = arith.constant 0 : index
      %14 = vector.load %arg4[%c0_12, %c0_13] : memref<512x8xbf16, #tpu.memory_space<vmem>>, vector<512x8xbf16>
      tpu.vector_store %arg4[%c0_12, %c0_13], %13 {strides = array<i32>} : memref<512x8xbf16, #tpu.memory_space<vmem>>, vector<512x8xbf16>,
      %cst_14 = arith.constant dense<0.000000e+00> : vector<8xf32>
      %15 = vector.multi_reduction <add>, %12, %cst_14 [0] : vector<512x8xf32> to vector<8xf32>
      %16 = vector.shape_cast %15 : vector<8xf32> to vector<1x8xf32>
      %17 = arith.mulf %12, %12 : vector<512x8xf32>
      %cst_15 = arith.constant dense<0.000000e+00> : vector<8xf32>
      %18 = vector.multi_reduction <add>, %17, %cst_15 [0] : vector<512x8xf32> to vector<8xf32>
      %19 = vector.shape_cast %18 : vector<8xf32> to vector<1x8xf32>
      %20 = tpu.concatenate %16, %19 in 0 : vector<1x8xf32>, vector<1x8xf32> -> vector<2x8xf32>
      %c0_16 = arith.constant 0 : index
      %c0_17 = arith.constant 0 : index
      %c0_18 = arith.constant 0 : index
      %21 = vector.load %arg5[%c0_16, %c0_17, %c0_18] : memref<1x2x8xf32, #tpu.memory_space<vmem>>, vector<1x2x8xf32>
      %22 = vector.shape_cast %21 : vector<1x2x8xf32> to vector<2x8xf32>
      %23 = vector.shape_cast %20 : vector<2x8xf32> to vector<1x2x8xf32>
      tpu.vector_store %arg5[%c0_16, %c0_17, %c0_18], %23 {strides = array<i32>} : memref<1x2x8xf32, #tpu.memory_space<vmem>>, vector<1x2x8xf32>,
    } else {
    }
    return
  }
  func.func @transform_0(%arg0: i32, %arg1: i32) -> (i32, i32) {
    %c0_i32 = arith.constant 0 : i32
    return %arg0, %arg1 : i32, i32
  }
  func.func @transform_1(%arg0: i32, %arg1: i32) -> (i32, i32) {
    %c0_i32 = arith.constant 0 : i32
    %c0_i32_0 = arith.constant 0 : i32
    return %arg1, %c0_i32 : i32, i32
  }
  func.func @transform_2(%arg0: i32, %arg1: i32) -> (i32, i32) {
    %c0_i32 = arith.constant 0 : i32
    %c0_i32_0 = arith.constant 0 : i32
    return %arg0, %c0_i32 : i32, i32
  }
  func.func @transform_3(%arg0: i32, %arg1: i32) -> (i32, i32, i32) {
    %c0_i32 = arith.constant 0 : i32
    %c0_i32_0 = arith.constant 0 : i32
    %c0_i32_1 = arith.constant 0 : i32
    return %arg0, %c0_i32, %c0_i32_0 : i32, i32, i32
  }
}

module attributes {stable_mosaic.version = 11 : i64} {
  func.func @_bn_act_kernel(%arg0: i32, %arg1: memref<32x128xbf16, #tpu.memory_space<vmem>>, %arg2: memref<1x128xf32, #tpu.memory_space<vmem>>, %arg3: memref<1x128xf32, #tpu.memory_space<vmem>>, %arg4: memref<32x128xf32, #tpu.memory_space<vmem>>) attributes {dimension_semantics = [#tpu.dimension_semantics<parallel>], iteration_bounds = array<i64: 1>, scalar_prefetch = 0 : i64, scratch_operands = 0 : i64, tpu.core_type = #tpu.core_type<tc>, window_params = [{transform_indices = @transform_0, window_bounds = array<i64: 32, 128>}, {pipeline_mode = #tpu.pipeline_mode<synchronous>, transform_indices = @transform_1, window_bounds = array<i64: 1, 128>}, {pipeline_mode = #tpu.pipeline_mode<synchronous>, transform_indices = @transform_2, window_bounds = array<i64: 1, 128>}, {transform_indices = @transform_3, window_bounds = array<i64: 32, 128>}]} {
    %c0 = arith.constant 0 : index
    %c0_0 = arith.constant 0 : index
    %0 = vector.load %arg1[%c0, %c0_0] : memref<32x128xbf16, #tpu.memory_space<vmem>>, vector<32x128xbf16>
    %1 = arith.extf %0 : vector<32x128xbf16> to vector<32x128xf32>
    %c0_1 = arith.constant 0 : index
    %c0_2 = arith.constant 0 : index
    %2 = vector.load %arg2[%c0_1, %c0_2] : memref<1x128xf32, #tpu.memory_space<vmem>>, vector<1x128xf32>
    %3 = vector.broadcast %2 : vector<1x128xf32> to vector<32x128xf32>
    %4 = arith.mulf %1, %3 : vector<32x128xf32>
    %c0_3 = arith.constant 0 : index
    %c0_4 = arith.constant 0 : index
    %5 = vector.load %arg3[%c0_3, %c0_4] : memref<1x128xf32, #tpu.memory_space<vmem>>, vector<1x128xf32>
    %6 = vector.broadcast %5 : vector<1x128xf32> to vector<32x128xf32>
    %7 = arith.addf %4, %6 : vector<32x128xf32>
    %cst = arith.constant 0.000000e+00 : f32
    %8 = vector.broadcast %cst : f32 to vector<32x128xf32>
    %9 = arith.cmpf oge, %7, %8 : vector<32x128xf32>
    %cst_5 = arith.constant 1.000000e-01 : f32
    %10 = vector.broadcast %cst_5 : f32 to vector<32x128xf32>
    %11 = arith.mulf %10, %7 : vector<32x128xf32>
    %12 = arith.select %9, %7, %11 : vector<32x128xi1>, vector<32x128xf32>
    %c0_6 = arith.constant 0 : index
    %c0_7 = arith.constant 0 : index
    %13 = vector.load %arg4[%c0_6, %c0_7] : memref<32x128xf32, #tpu.memory_space<vmem>>, vector<32x128xf32>
    tpu.vector_store %arg4[%c0_6, %c0_7], %12 {strides = array<i32>} : memref<32x128xf32, #tpu.memory_space<vmem>>, vector<32x128xf32>,
    return
  }
  func.func @transform_0(%arg0: i32) -> (i32, i32) {
    %c0_i32 = arith.constant 0 : i32
    %c0_i32_0 = arith.constant 0 : i32
    return %arg0, %c0_i32 : i32, i32
  }
  func.func @transform_1(%arg0: i32) -> (i32, i32) {
    %c0_i32 = arith.constant 0 : i32
    %c0_i32_0 = arith.constant 0 : i32
    %c0_i32_1 = arith.constant 0 : i32
    return %c0_i32, %c0_i32_0 : i32, i32
  }
  func.func @transform_2(%arg0: i32) -> (i32, i32) {
    %c0_i32 = arith.constant 0 : i32
    %c0_i32_0 = arith.constant 0 : i32
    %c0_i32_1 = arith.constant 0 : i32
    return %c0_i32, %c0_i32_0 : i32, i32
  }
  func.func @transform_3(%arg0: i32) -> (i32, i32) {
    %c0_i32 = arith.constant 0 : i32
    %c0_i32_0 = arith.constant 0 : i32
    return %arg0, %c0_i32 : i32, i32
  }
}

</mosaic_0001>

<bundles_post_ra>
// kernel: cnn_block_forward.3
= control target key start
LH: loop header
LB: loop body
LE: loop exit
PB: predicated region body
PF: predicated region fallthrough
CT: control target
= control target key end

     0   :  { %s119_s0 = inlined_call_operand.vmem [shape: bf16[32,128], index: 0, kind: input, shape index: {}]   ;;  %s120_s1 = inlined_call_operand.vmem [shape: f32[1,128], index: 1, kind: input, shape index: {}]   ;;  %s121_s2 = inlined_call_operand.vmem [shape: f32[1,128], index: 2, kind: input, shape index: {}]   ;;  %s122_s3 = inlined_call_operand.vmem [shape: f32[32,128], index: 3, kind: output, shape index: {}]  }
   0x1   :  { %v67_v0 = vld [vmem:[%s119_s0] sm:$0xff]   ;;  %v74_v4 = vld [vmem:[%s119_s0 + $0x8] sm:$0xff]  }
   0x2   :  { %v64_v1 = vld [vmem:[%s120_s1] ss:$0 sm:$0xff]  ;;  %v68_v2 = vunpack.c.l.bf16 %v67_v0  ;;  %v69_v3 = vunpack.c.h.bf16 %v67_v0  ;;  %v72_v6 = vunpack.c.l.bf16 %v74_v4  ;;  %v73_v7 = vunpack.c.h.bf16 %v74_v4 }
   0x3   :  { %v65_v5 = vld [vmem:[%s121_s2] ss:$0 sm:$0xff] }
   0x4   :  { %v29_v8 = vmul.f32 %v68_v2, %v64_v1  ;;  %v30_v9 = vmul.f32 %v69_v3, %v64_v1  ;;  %v31_v10 = vmul.f32 %v72_v6, %v64_v1  ;;  %v32_v11 = vmul.f32 %v73_v7, %v64_v1 }
   0x6   :  { %v40_v12 = vadd.f32 %v65_v5, %v29_v8  ;;  %v41_v13 = vadd.f32 %v65_v5, %v30_v9  ;;  %v42_v14 = vadd.f32 %v65_v5, %v31_v10  ;;  %v43_v15 = vadd.f32 %v65_v5, %v32_v11 }
   0x8   :  { %vm44_vm0 = vcmp.ge.f32.partialorder %v40_v12, 0.0  ;;  %v48_v16 = vmul.f32 0.1, %v40_v12  ;;  %vm45_vm1 = vcmp.ge.f32.partialorder %v41_v13, 0.0  ;;  %v49_v17 = vmul.f32 0.1, %v41_v13 }
   0x9   :  { %vm46_vm2 = vcmp.ge.f32.partialorder %v42_v14, 0.0  ;;  %v50_v18 = vmul.f32 0.1, %v42_v14  ;;  %vm47_vm3 = vcmp.ge.f32.partialorder %v43_v15, 0.0  ;;  %v51_v19 = vmul.f32 0.1, %v43_v15 }
   0xa   :  { %v52_v20 = vsel %vm44_vm0, %v40_v12, %v48_v16  ;;  %v53_v21 = vsel %vm45_vm1, %v41_v13, %v49_v17 }
   0xb   :  { %56 = vst [vmem:[%s122_s3] sm:$0xff] %v52_v20  ;;  %57 = vst [vmem:[%s122_s3 + $0x8] sm:$0xff] %v53_v21  ;;  %v54_v22 = vsel %vm46_vm2, %v42_v14, %v50_v18  ;;  %v55_v23 = vsel %vm47_vm3, %v43_v15, %v51_v19 }
   0xc   :  { %58 = vst [vmem:[%s122_s3 + $0x10] sm:$0xff] %v54_v22  ;;  %59 = vst [vmem:[%s122_s3 + $0x18] sm:$0xff] %v55_v23 }

// kernel: cnn_block_forward.2
= control target key start
LH: loop header
LB: loop body
LE: loop exit
PB: predicated region body
PF: predicated region fallthrough
CT: control target
= control target key end

     0   :  { %vm18_vm0 = vcmask 64512   ;;  %v1984_v1 = vmov 0.0   ;;  %vm391_vm1 = vcmask 326656   ;;  %vm488_vm2 = vcmask 1043456   ;;  %s3066_s1 = inlined_call_operand.vmem [shape: bf16[40,8], index: 1, kind: input, shape index: {}]   ;;  %s3067_s0 = inlined_call_operand.vmem [shape: bf16[512,40], index: 0, kind: input, shape index: {}]   ;;  %s3068_s2 = inlined_call_operand.vmem [shape: bf16[512,8], index: 2, kind: output, shape index: {0}]   ;;  %s3069_s3 = inlined_call_operand.vmem [shape: f32[1,2,8], index: 3, kind: output, shape index: {1}]  }
   0x1   :  { %v2008_v0 = vld [vmem:[%s3066_s1] sm:$0xff]   ;;  %21 = vst.msk [vmem:[#allocation2 + $0x10] sm:$0xff] %vm18_vm0, %v1984_v1  ;;  %19 = vst.msk [vmem:[#allocation2] sm:$0xff] %vm18_vm0, %v1984_v1  ;;  %v1950_v2 = vld [vmem:[%s3066_s1 + $0x8] sm:$0xff]   ;;  %vm1233_vm3 = vcmask 60416   ;;  %vm1628_vm4 = vcmask 1040384  }
   0x2   :  { %20 = vst.msk [vmem:[#allocation2 + $0x8] sm:$0xff] %vm18_vm0, %v1984_v1  ;;  %22 = vst.msk [vmem:[#allocation2 + $0x18] sm:$0xff] %vm18_vm0, %v1984_v1  ;;  %1870 = vmatprep.subr.bf16.mxu0 %v2008_v0  ;;  %1940 = vmatprep.subr.bf16.mxu1 %v2008_v0  ;;  %v1952_v3 = vld [vmem:[%s3067_s0] sm:$0xff]   ;;  %v1951_v4 = vld [vmem:[%s3066_s1 + $0x10] ss:$0 sps:$4 sm:$0xff]   ;;  %vm1630_vm5 = vcmask 58368  }
   0x3   :  { %23 = vst.msk [vmem:[#allocation2 + $0x20] sm:$0xff] %vm18_vm0, %v1984_v1  ;;  %24 = vst.msk [vmem:[#allocation2 + $0x28] sm:$0xff] %vm18_vm0, %v1984_v1  ;;  %1871 = vmatpush3.bf16.msra.mxu0 %v2008_v0  ;;  %1943 = vmatpush3.bf16.msra.mxu1 %v2008_v0  ;;  %v490_v5 = vsel %vm488_vm2, %v1951_v4, 0  ;;  %v1953_v6 = vld [vmem:[%s3067_s0 + $0x8] sm:$0xff]   ;;  %v1954_v7 = vld [vmem:[%s3067_s0 + $0x10] sm:$0xff]  }
   0x4   :  { %25 = vst.msk [vmem:[#allocation2 + $0x30] sm:$0xff] %vm18_vm0, %v1984_v1  ;;  %26 = vst.msk [vmem:[#allocation2 + $0x38] sm:$0xff] %vm18_vm0, %v1984_v1  ;;  %1872 = vmatprep.subr.bf16.mxu0 %v1950_v2  ;;  %1941 = vmatprep.subr.bf16.mxu1 %v1950_v2  ;;  %v1955_v8 = vld [vmem:[%s3067_s0 + $0x18] sm:$0xff]   ;;  %v1956_v9 = vld [vmem:[%s3067_s0 + $0x20] sm:$0xff]  }
   0x5   :  { %27 = vst.msk [vmem:[#allocation2 + $0x40] sm:$0xff] %vm18_vm0, %v1984_v1  ;;  %28 = vst.msk [vmem:[#allocation2 + $0x48] sm:$0xff] %vm18_vm0, %v1984_v1  ;;  %1876 = vmatprep.mubr.msk.bf16.mxu0 %vm391_vm1, %v1952_v3  ;;  %v1968_v10 = vld [vmem:[%s3067_s0 + $0x80] sm:$0xff]   ;;  %v1969_v11 = vld [vmem:[%s3067_s0 + $0x88] sm:$0xff]  }
   0x6   :  { %29 = vst.msk [vmem:[#allocation2 + $0x50] sm:$0xff] %vm18_vm0, %v1984_v1  ;;  %30 = vst.msk [vmem:[#allocation2 + $0x58] sm:$0xff] %vm18_vm0, %v1984_v1  ;;  %1908 = vmatprep.mubr.msk.bf16.mxu1 %vm391_vm1, %v1968_v10  ;;  %v1970_v12 = vld [vmem:[%s3067_s0 + $0x90] sm:$0xff]   ;;  %v1957_v13 = vld [vmem:[%s3067_s0 + $0x28] sm:$0xff]  }
   0x7   :  { %31 = vst.msk [vmem:[#allocation2 + $0x60] sm:$0xff] %vm18_vm0, %v1984_v1  ;;  %32 = vst.msk [vmem:[#allocation2 + $0x68] sm:$0xff] %vm18_vm0, %v1984_v1  ;;  %1873 = vmatpush3.bf16.msra.mxu0 %v1950_v2  ;;  %1944 = vmatpush3.bf16.msra.mxu1 %v1950_v2  ;;  %v1958_v14 = vld [vmem:[%s3067_s0 + $0x30] sm:$0xff]   ;;  %v1971_v15 = vld [vmem:[%s3067_s0 + $0x98] sm:$0xff]  }
   0x8   :  { %33 = vst.msk [vmem:[#allocation2 + $0x70] sm:$0xff] %vm18_vm0, %v1984_v1  ;;  %34 = vst.msk [vmem:[#allocation2 + $0x78] sm:$0xff] %vm18_vm0, %v1984_v1  ;;  %1946 = vmatprep.subr.msk.bf16.mxu0 %vm488_vm2, %v1951_v4  ;;  %1947 = vmatprep.subr.msk.bf16.mxu1 %vm488_vm2, %v1951_v4  ;;  %v1972_v16 = vld [vmem:[%s3067_s0 + $0xa0] sm:$0xff]   ;;  %v1959_v17 = vld [vmem:[%s3067_s0 + $0x38] sm:$0xff]  }
   0x9   :  { %35 = vst.msk [vmem:[#allocation2 + $0x80] sm:$0xff] %vm18_vm0, %v1984_v1  ;;  %36 = vst.msk [vmem:[#allocation2 + $0x88] sm:$0xff] %vm18_vm0, %v1984_v1  ;;  %v1973_v18 = vld [vmem:[%s3067_s0 + $0xa8] sm:$0xff]   ;;  %v1960_v19 = vld [vmem:[%s3067_s0 + $0x40] sm:$0xff]  }
   0xa   :  { %37 = vst.msk [vmem:[#allocation2 + $0x90] sm:$0xff] %vm18_vm0, %v1984_v1  ;;  %38 = vst.msk [vmem:[#allocation2 + $0x98] sm:$0xff] %vm18_vm0, %v1984_v1  ;;  %v1974_v20 = vld [vmem:[%s3067_s0 + $0xb0] sm:$0xff]   ;;  %v1961_v21 = vld [vmem:[%s3067_s0 + $0x48] sm:$0xff]  }
   0xb   :  { %39 = vst.msk [vmem:[#allocation2 + $0xa0] sm:$0xff] %vm18_vm0, %v1984_v1  ;;  %40 = vst.msk [vmem:[#allocation2 + $0xa8] sm:$0xff] %vm18_vm0, %v1984_v1  ;;  %1875 = vmatpush3.bf16.msra.mxu0 %v490_v5  ;;  %1945 = vmatpush3.bf16.msra.mxu1 %v490_v5  ;;  %v1975_v22 = vld [vmem:[%s3067_s0 + $0xb8] sm:$0xff]   ;;  %v1962_v23 = vld [vmem:[%s3067_s0 + $0x50] sm:$0xff]  }
   0xc   :  { %41 = vst.msk [vmem:[#allocation2 + $0xb0] sm:$0xff] %vm18_vm0, %v1984_v1  ;;  %42 = vst.msk [vmem:[#allocation2 + $0xb8] sm:$0xff] %vm18_vm0, %v1984_v1  ;;  %v1976_v24 = vld [vmem:[%s3067_s0 + $0xc0] sm:$0xff]   ;;  %v1963_v25 = vld [vmem:[%s3067_s0 + $0x58] sm:$0xff]  }
   0xd   :  { %43 = vst.msk [vmem:[#allocation2 + $0xc0] sm:$0xff] %vm18_vm0, %v1984_v1  ;;  %44 = vst.msk [vmem:[#allocation2 + $0xc8] sm:$0xff] %vm18_vm0, %v1984_v1  ;;  %v1977_v26 = vld [vmem:[%s3067_s0 + $0xc8] sm:$0xff]   ;;  %v1964_v27 = vld [vmem:[%s3067_s0 + $0x60] sm:$0xff]  }
   0xe   :  { %45 = vst.msk [vmem:[#allocation2 + $0xd0] sm:$0xff] %vm18_vm0, %v1984_v1  ;;  %46 = vst.msk [vmem:[#allocation2 + $0xd8] sm:$0xff] %vm18_vm0, %v1984_v1  ;;  %1877 = vmatmul.mubr.msk.bf16.vlgmr.msra.gmra.mrb[0].mxu0 %vm391_vm1, %v1953_v6  ;;  %1909 = vmatmul.mubr.msk.bf16.vlgmr.msra.gmra.mrb[0].mxu1 %vm391_vm1, %v1969_v11  ;;  %v1978_v28 = vld [vmem:[%s3067_s0 + $0xd0] sm:$0xff]   ;;  %v1965_v29 = vld [vmem:[%s3067_s0 + $0x68] sm:$0xff]  }
   0xf   :  { %47 = vst.msk [vmem:[#allocation2 + $0xe0] sm:$0xff] %vm18_vm0, %v1984_v1  ;;  %48 = vst.msk [vmem:[#allocation2 + $0xe8] sm:$0xff] %vm18_vm0, %v1984_v1  ;;  %1880 = vmatprep.mubr.msk.bf16.mxu0 %vm391_vm1, %v1954_v7  ;;  %1912 = vmatprep.mubr.msk.bf16.mxu1 %vm391_vm1, %v1970_v12  ;;  %v1979_v30 = vld [vmem:[%s3067_s0 + $0xd8] sm:$0xff]   ;;  %v1966_v31 = vld [vmem:[%s3067_s0 + $0x70] sm:$0xff]  }
  0x10   :  { %49 = vst.msk [vmem:[#allocation2 + $0xf0] sm:$0xff] %vm18_vm0, %v1984_v1  ;;  %50 = vst.msk [vmem:[#allocation2 + $0xf8] sm:$0xff] %vm18_vm0, %v1984_v1  ;;  %v1980_v32 = vld [vmem:[%s3067_s0 + $0xe0] sm:$0xff]   ;;  %v1967_v33 = vld [vmem:[%s3067_s0 + $0x78] sm:$0xff]  }
  0x11   :  { %51 = vst.msk [vmem:[#allocation2 + $0x100] sm:$0xff] %vm18_vm0, %v1984_v1  ;;  %52 = vst.msk [vmem:[#allocation2 + $0x108] sm:$0xff] %vm18_vm0, %v1984_v1  ;;  %v1981_v34 = vld [vmem:[%s3067_s0 + $0xe8] sm:$0xff]   ;;  %v1982_v35 = vld [vmem:[%s3067_s0 + $0xf0] sm:$0xff]  }
  0x12   :  { %53 = vst.msk [vmem:[#allocation2 + $0x110] sm:$0xff] %vm18_vm0, %v1984_v1  ;;  %54 = vst.msk [vmem:[#allocation2 + $0x118] sm:$0xff] %vm18_vm0, %v1984_v1  ;;  %v1983_v36 = vld [vmem:[%s3067_s0 + $0xf8] sm:$0xff]   ;;  %v85_v37 = vld [vmem:[#allocation2 + $0x10] sm:$0xff] }
  0x13   :  { %55 = vst.msk [vmem:[#allocation2 + $0x120] sm:$0xff] %vm18_vm0, %v1984_v1  ;;  %56 = vst.msk [vmem:[#allocation2 + $0x128] sm:$0xff] %vm18_vm0, %v1984_v1  ;;  %v83_v38 = vld [vmem:[#allocation2] sm:$0xff]  ;;  %v86_v40 = vld [vmem:[#allocation2 + $0x18] sm:$0xff] }
  0x14   :  { %57 = vst.msk [vmem:[#allocation2 + $0x130] sm:$0xff] %vm18_vm0, %v1984_v1  ;;  %58 = vst.msk [vmem:[#allocation2 + $0x138] sm:$0xff] %vm18_vm0, %v1984_v1  ;;  %v84_v43 = vld [vmem:[#allocation2 + $0x8] sm:$0xff]  ;;  %v89_v49 = vld [vmem:[#allocation2 + $0x30] sm:$0xff] }
  0x15   :  { %59 = vst.msk [vmem:[#allocation2 + $0x140] sm:$0xff] %vm18_vm0, %v1984_v1  ;;  %60 = vst.msk [vmem:[#allocation2 + $0x148] sm:$0xff] %vm18_vm0, %v1984_v1  ;;  %v87_v51 = vld [vmem:[#allocation2 + $0x20] sm:$0xff]  ;;  %v90_v54 = vld [vmem:[#allocation2 + $0x38] sm:$0xff] }
  0x16   :  { %61 = vst.msk [vmem:[#allocation2 + $0x150] sm:$0xff] %vm18_vm0, %v1984_v1  ;;  %62 = vst.msk [vmem:[#allocation2 + $0x158] sm:$0xff] %vm18_vm0, %v1984_v1  ;;  %1881 = vmatmul.mubr.msk.bf16.gmra.mrb[4].mxu0 %vm391_vm1, %v1955_v8  ;;  %1913 = vmatmul.mubr.msk.bf16.gmra.mrb[4].mxu1 %vm391_vm1, %v1971_v15  ;;  %v88_v58 = vld [vmem:[#allocation2 + $0x28] sm:$0xff] }
  0x17   :  { %63 = vst.msk [vmem:[#allocation2 + $0x160] sm:$0xff] %vm18_vm0, %v1984_v1  ;;  %64 = vst.msk [vmem:[#allocation2 + $0x168] sm:$0xff] %vm18_vm0, %v1984_v1  ;;  %1884 = vmatprep.mubr.msk.bf16.mxu0 %vm391_vm1, %v1956_v9  ;;  %1916 = vmatprep.mubr.msk.bf16.mxu1 %vm391_vm1, %v1972_v16 }
  0x18   :  { %65 = vst.msk [vmem:[#allocation2 + $0x170] sm:$0xff] %vm18_vm0, %v1984_v1  ;;  %66 = vst.msk [vmem:[#allocation2 + $0x178] sm:$0xff] %vm18_vm0, %v1984_v1  ;;  %v115_v52 = vld [vmem:[#allocation2 + $0x100] sm:$0xff]  ;;  %v116_v12 = vld [vmem:[#allocation2 + $0x108] sm:$0xff] }
  0x19   :  { %67 = vst.msk [vmem:[#allocation2 + $0x180] sm:$0xff] %vm18_vm0, %v1984_v1  ;;  %68 = vst.msk [vmem:[#allocation2 + $0x188] sm:$0xff] %vm18_vm0, %v1984_v1  ;;  %v117_v50 = vld [vmem:[#allocation2 + $0x110] sm:$0xff]  ;;  %v118_v11 = vld [vmem:[#allocation2 + $0x118] sm:$0xff] }
  0x1a   :  { %69 = vst.msk [vmem:[#allocation2 + $0x190] sm:$0xff] %vm18_vm0, %v1984_v1  ;;  %70 = vst.msk [vmem:[#allocation2 + $0x198] sm:$0xff] %vm18_vm0, %v1984_v1 }
  0x1b   :  { %71 = vst.msk [vmem:[#allocation2 + $0x1a0] sm:$0xff] %vm18_vm0, %v1984_v1  ;;  %72 = vst.msk [vmem:[#allocation2 + $0x1a8] sm:$0xff] %vm18_vm0, %v1984_v1 }
  0x1c   :  { %73 = vst.msk [vmem:[#allocation2 + $0x1b0] sm:$0xff] %vm18_vm0, %v1984_v1  ;;  %74 = vst.msk [vmem:[#allocation2 + $0x1b8] sm:$0xff] %vm18_vm0, %v1984_v1 }
  0x1d   :  { %75 = vst.msk [vmem:[#allocation2 + $0x1c0] sm:$0xff] %vm18_vm0, %v1984_v1  ;;  %76 = vst.msk [vmem:[#allocation2 + $0x1c8] sm:$0xff] %vm18_vm0, %v1984_v1 }
  0x1e   :  { %77 = vst.msk [vmem:[#allocation2 + $0x1d0] sm:$0xff] %vm18_vm0, %v1984_v1  ;;  %78 = vst.msk [vmem:[#allocation2 + $0x1d8] sm:$0xff] %vm18_vm0, %v1984_v1  ;;  %1885 = vmatmul.mubr.msk.bf16.gmra.mrb[8].mxu0 %vm391_vm1, %v1957_v13  ;;  %1917 = vmatmul.mubr.msk.bf16.gmra.mrb[8].mxu1 %vm391_vm1, %v1973_v18 }
  0x1f   :  { %79 = vst.msk [vmem:[#allocation2 + $0x1e0] sm:$0xff] %vm18_vm0, %v1984_v1  ;;  %80 = vst.msk [vmem:[#allocation2 + $0x1e8] sm:$0xff] %vm18_vm0, %v1984_v1  ;;  %1888 = vmatprep.mubr.msk.bf16.mxu0 %vm391_vm1, %v1958_v14  ;;  %1920 = vmatprep.mubr.msk.bf16.mxu1 %vm391_vm1, %v1974_v20  ;;  %v93_v20 = vld [vmem:[#allocation2 + $0x50] sm:$0xff] }
  0x20   :  { %81 = vst.msk [vmem:[#allocation2 + $0x1f0] sm:$0xff] %vm18_vm0, %v1984_v1  ;;  %82 = vst.msk [vmem:[#allocation2 + $0x1f8] sm:$0xff] %vm18_vm0, %v1984_v1 }
  0x26   :  { %1889 = vmatmul.mubr.msk.bf16.gmra.mrb[12].mxu0 %vm391_vm1, %v1959_v17  ;;  %1921 = vmatmul.mubr.msk.bf16.gmra.mrb[12].mxu1 %vm391_vm1, %v1975_v22 }
  0x27   :  { %1892 = vmatprep.mubr.msk.bf16.mxu0 %vm391_vm1, %v1960_v19  ;;  %1924 = vmatprep.mubr.msk.bf16.mxu1 %vm391_vm1, %v1976_v24 }
  0x2e   :  { %1893 = vmatmul.mubr.msk.bf16.gmra.mrb[16].mxu0 %vm391_vm1, %v1961_v21  ;;  %1925 = vmatmul.mubr.msk.bf16.gmra.mrb[16].mxu1 %vm391_vm1, %v1977_v26  ;;  %v121_v21 = vld [vmem:[#allocation2 + $0x130] sm:$0xff]  ;;  %v119_v26 = vld [vmem:[#allocation2 + $0x120] sm:$0xff] }
  0x2f   :  { %1896 = vmatprep.mubr.msk.bf16.mxu0 %vm391_vm1, %v1962_v23  ;;  %1928 = vmatprep.mubr.msk.bf16.mxu1 %vm391_vm1, %v1978_v28  ;;  %v91_v23 = vld [vmem:[#allocation2 + $0x40] sm:$0xff] }
  0x36   :  { %1897 = vmatmul.mubr.msk.bf16.gmra.mrb[20].mxu0 %vm391_vm1, %v1963_v25  ;;  %1929 = vmatmul.mubr.msk.bf16.gmra.mrb[20].mxu1 %vm391_vm1, %v1979_v30 }
  0x37   :  { %1900 = vmatprep.mubr.msk.bf16.mxu0 %vm391_vm1, %v1964_v27  ;;  %1932 = vmatprep.mubr.msk.bf16.mxu1 %vm391_vm1, %v1980_v32 }
  0x3e   :  { %1901 = vmatmul.mubr.msk.bf16.gmra.mrb[24].mxu0 %vm391_vm1, %v1965_v29  ;;  %1933 = vmatmul.mubr.msk.bf16.gmra.mrb[24].mxu1 %vm391_vm1, %v1981_v34 }
  0x3f   :  { %1904 = vmatprep.mubr.msk.bf16.mxu0 %vm391_vm1, %v1966_v31  ;;  %1936 = vmatprep.mubr.msk.bf16.mxu1 %vm391_vm1, %v1982_v35 }
  0x46   :  { %1905 = vmatmul.mubr.msk.bf16.gmra.mrb[28].mxu0 %vm391_vm1, %v1967_v33  ;;  %1937 = vmatmul.mubr.msk.bf16.gmra.mrb[28].mxu1 %vm391_vm1, %v1983_v36 }
  0xe1   :  { %v1878_v39 = vpop.f32.mrb[0].mxu0  ;;  %v1910_v55 = vpop.f32.mrb[0].mxu1 }
  0xe2   :  { %v783_v41 = vadd.f32 %v1878_v39, %v85_v37  ;;  %v526_v42 = vpop.f32.mrb[1].mxu0  ;;  %v815_v59 = vadd.f32 %v1910_v55, %v117_v50  ;;  %v654_v60 = vpop.f32.mrb[1].mxu1 }
  0xe3   :  { %v781_v44 = vadd.f32 %v526_v42, %v83_v38  ;;  %v1879_v45 = vpop.f32.mrb[2].mxu0  ;;  %v813_v0 = vadd.f32 %v654_v60, %v115_v52  ;;  %v1911_v1 = vpop.f32.mrb[2].mxu1 }
  0xe4   :  { %848 = vst.msk [vmem:[#allocation2 + $0x10] sm:$0xff] %vm18_vm0, %v783_v41  ;;  %v784_v46 = vadd.f32 %v1879_v45, %v86_v40  ;;  %v529_v47 = vpop.f32.mrb[3].mxu0  ;;  %880 = vst.msk [vmem:[#allocation2 + $0x110] sm:$0xff] %vm18_vm0, %v815_v59  ;;  %v657_v6 = vpop.f32.mrb[3].mxu1  ;;  %v816_v24 = vadd.f32 %v1911_v1, %v118_v11 }
  0xe5   :  { %846 = vst.msk [vmem:[#allocation2] sm:$0xff] %vm18_vm0, %v781_v44  ;;  %v782_v48 = vadd.f32 %v529_v47, %v84_v43  ;;  %878 = vst.msk [vmem:[#allocation2 + $0x100] sm:$0xff] %vm18_vm0, %v813_v0  ;;  %v814_v25 = vadd.f32 %v657_v6, %v116_v12 }
  0xe6   :  { %849 = vst.msk [vmem:[#allocation2 + $0x18] sm:$0xff] %vm18_vm0, %v784_v46  ;;  %881 = vst.msk [vmem:[#allocation2 + $0x118] sm:$0xff] %vm18_vm0, %v816_v24 }
  0xe7   :  { %847 = vst.msk [vmem:[#allocation2 + $0x8] sm:$0xff] %vm18_vm0, %v782_v48  ;;  %879 = vst.msk [vmem:[#allocation2 + $0x108] sm:$0xff] %vm18_vm0, %v814_v25 }
  0xe9   :  { %v1882_v53 = vpop.f32.mrb[4].mxu0  ;;  %v1914_v32 = vpop.f32.mrb[4].mxu1 }
  0xea   :  { %v787_v56 = vadd.f32 %v1882_v53, %v89_v49  ;;  %v542_v57 = vpop.f32.mrb[5].mxu0  ;;  %v819_v37 = vadd.f32 %v1914_v32, %v121_v21  ;;  %v670_v38 = vpop.f32.mrb[5].mxu1 }
  0xeb   :  { %v915_v61 = vld [vmem:[#allocation2 + $0x10] sm:$0xff]  ;;  %v785_v62 = vadd.f32 %v542_v57, %v87_v51  ;;  %v1883_v63 = vpop.f32.mrb[6].mxu0  ;;  %v817_v44 = vadd.f32 %v670_v38, %v119_v26  ;;  %v2311_v45 = vpop.f32.mrb[6].mxu1  ;;  %v94_v57 = vld [vmem:[#allocation2 + $0x58] sm:$0xff] }
  0xec   :  { %v1773_v2 = vpack.c.bf16 %v915_v61, %v915_v61  ;;  %v913_v3 = vld [vmem:[#allocation2] sm:$0xff]  ;;  %852 = vst.msk [vmem:[#allocation2 + $0x30] sm:$0xff] %vm18_vm0, %v787_v56  ;;  %v788_v4 = vadd.f32 %v1883_v63, %v90_v54  ;;  %v545_v5 = vpop.f32.mrb[7].mxu0  ;;  %v1433_v13 = vmul.f32 %v915_v61, %v915_v61  ;;  %v1301_v27 = vsel %vm18_vm0, %v915_v61, 0.0  ;;  %884 = vst.msk [vmem:[#allocation2 + $0x130] sm:$0xff] %vm18_vm0, %v819_v37  ;;  %v2315_v51 = vpop.f32.mrb[7].mxu1 }
  0xed   :  { %v1771_v7 = vpack.c.bf16 %v913_v3, %v913_v3  ;;  %v1431_v8 = vmul.f32 %v913_v3, %v913_v3  ;;  %v916_v9 = vld [vmem:[#allocation2 + $0x18] sm:$0xff]  ;;  %850 = vst.msk [vmem:[#allocation2 + $0x20] sm:$0xff] %vm18_vm0, %v785_v62  ;;  %v786_v10 = vadd.f32 %v545_v5, %v88_v58  ;;  %v1298_v16 = vsel %vm18_vm0, %v913_v3, 0.0  ;;  %882 = vst.msk [vmem:[#allocation2 + $0x120] sm:$0xff] %vm18_vm0, %v817_v44  ;;  %v92_v62 = vld [vmem:[#allocation2 + $0x48] sm:$0xff] }
  0xee   :  { %1236 = vst.msk [vmem:[%s3068_s2 + $0x8] sm:$0xf] %vm1233_vm3, %v1773_v2  ;;  %v1774_v14 = vpack.c.bf16 %v916_v9, %v916_v9  ;;  %v914_v15 = vld [vmem:[#allocation2 + $0x8] sm:$0xff]  ;;  %v1434_v29 = vmul.f32 %v916_v9, %v916_v9  ;;  %v1498_v39 = vsel %vm18_vm0, %v1433_v13, 0.0  ;;  %v1303_v40 = vsel %vm18_vm0, %v916_v9, 0.0  ;;  %v2325_v63 = vld [vmem:[#allocation2 + $0x110] sm:$0xff] }
  0xef   :  { %853 = vst.msk [vmem:[#allocation2 + $0x38] sm:$0xff] %vm18_vm0, %v788_v4  ;;  %v1772_v17 = vpack.c.bf16 %v914_v15, %v914_v15  ;;  %v1299_v18 = vsel %vm18_vm0, %v914_v15, 0.0  ;;  %v1432_v19 = vmul.f32 %v914_v15, %v914_v15  ;;  %851 = vst.msk [vmem:[#allocation2 + $0x28] sm:$0xff] %vm18_vm0, %v786_v10  ;;  %v1495_v28 = vsel %vm18_vm0, %v1431_v8, 0.0  ;;  %v97_v3 = vld [vmem:[#allocation2 + $0x70] sm:$0xff]  ;;  %v95_v8 = vld [vmem:[#allocation2 + $0x60] sm:$0xff] }
  0xf0   :  { %1234 = vst.msk [vmem:[%s3068_s2] sm:$0xf] %vm1233_vm3, %v1771_v7  ;;  %1237 = vst.msk [vmem:[%s3068_s2 + $0xc] sm:$0xf] %vm1233_vm3, %v1774_v14  ;;  %v1300_v22 = vadd.f32 %v1299_v18, %v1298_v16  ;;  %v1500_v52 = vsel %vm18_vm0, %v1434_v29, 0.0  ;;  %v2337_v9 = vld [vmem:[#allocation2 + $0x100] sm:$0xff]  ;;  %v1805_v14 = vpack.c.bf16 %v2325_v63, %v2325_v63 }
  0xf1   :  { %1235 = vst.msk [vmem:[%s3068_s2 + $0x4] sm:$0xf] %vm1233_vm3, %v1772_v17  ;;  %v1496_v30 = vsel %vm18_vm0, %v1432_v19, 0.0  ;;  %v1886_v31 = vpop.f32.mrb[8].mxu0  ;;  %v98_v13 = vld [vmem:[#allocation2 + $0x78] sm:$0xff]  ;;  %v2345_v15 = vpop.f32.mrb[8].mxu1 }
  0xf2   :  { %v1302_v33 = vadd.f32 %v1301_v27, %v1300_v22  ;;  %v1497_v34 = vadd.f32 %v1496_v30, %v1495_v28  ;;  %v791_v35 = vadd.f32 %v1886_v31, %v93_v20  ;;  %v558_v36 = vpop.f32.mrb[9].mxu0  ;;  %v2350_v21 = vpop.f32.mrb[9].mxu1  ;;  %v96_v27 = vld [vmem:[#allocation2 + $0x68] sm:$0xff]  ;;  %1268 = vst.msk [vmem:[%s3068_s2 + $0x88] sm:$0xf] %vm1233_vm3, %v1805_v14  ;;  %v1803_v28 = vpack.c.bf16 %v2337_v9, %v2337_v9  ;;  %v102_v14 = vld [vmem:[#allocation2 + $0x98] sm:$0xff] }
  0xf3   :  { %v919_v41 = vld [vmem:[#allocation2 + $0x30] sm:$0xff]  ;;  %v789_v42 = vadd.f32 %v558_v36, %v91_v23  ;;  %v1887_v43 = vpop.f32.mrb[10].mxu0  ;;  %v2361_v29 = vpop.f32.mrb[10].mxu1 }
  0xf4   :  { %v1304_v46 = vadd.f32 %v1303_v40, %v1302_v33  ;;  %v1499_v47 = vadd.f32 %v1498_v39, %v1497_v34  ;;  %v1777_v48 = vpack.c.bf16 %v919_v41, %v919_v41  ;;  %v917_v49 = vld [vmem:[#allocation2 + $0x20] sm:$0xff]  ;;  %856 = vst.msk [vmem:[#allocation2 + $0x50] sm:$0xff] %vm18_vm0, %v791_v35  ;;  %v561_v50 = vpop.f32.mrb[11].mxu0  ;;  %v1437_v0 = vmul.f32 %v919_v41, %v919_v41  ;;  %v2368_v36 = vpop.f32.mrb[11].mxu1 }
  0xf5   :  { %v1775_v53 = vpack.c.bf16 %v917_v49, %v917_v49  ;;  %v1305_v54 = vsel %vm18_vm0, %v917_v49, 0.0  ;;  %v1435_v55 = vmul.f32 %v917_v49, %v917_v49  ;;  %854 = vst.msk [vmem:[#allocation2 + $0x40] sm:$0xff] %vm18_vm0, %v789_v42  ;;  %v792_v7 = vadd.f32 %v1887_v43, %v94_v57 }
  0xf6   :  { %v920_v56 = vld [vmem:[#allocation2 + $0x38] sm:$0xff]  ;;  %v1501_v58 = vadd.f32 %v1500_v52, %v1499_v47  ;;  %1240 = vst.msk [vmem:[%s3068_s2 + $0x18] sm:$0xf] %vm1233_vm3, %v1777_v48  ;;  %v1306_v59 = vadd.f32 %v1305_v54, %v1304_v46  ;;  %v918_v61 = vld [vmem:[#allocation2 + $0x28] sm:$0xff]  ;;  %v790_v11 = vadd.f32 %v561_v50, %v92_v62  ;;  %v1309_v16 = vsel %vm18_vm0, %v919_v41, 0.0  ;;  %v101_v48 = vld [vmem:[#allocation2 + $0x90] sm:$0xff] }
  0xf7   :  { %v1778_v60 = vpack.c.bf16 %v920_v56, %v920_v56  ;;  %1238 = vst.msk [vmem:[%s3068_s2 + $0x10] sm:$0xf] %vm1233_vm3, %v1775_v53  ;;  %v1502_v1 = vsel %vm18_vm0, %v1435_v55, 0.0  ;;  %v1776_v2 = vpack.c.bf16 %v918_v61, %v918_v61  ;;  %v1307_v5 = vsel %vm18_vm0, %v918_v61, 0.0  ;;  %1266 = vst.msk [vmem:[%s3068_s2 + $0x80] sm:$0xf] %vm1233_vm3, %v1803_v28 }
  0xf8   :  { %v1503_v4 = vadd.f32 %v1502_v1, %v1501_v58  ;;  %v1436_v6 = vmul.f32 %v918_v61, %v918_v61  ;;  %v1308_v10 = vadd.f32 %v1307_v5, %v1306_v59  ;;  %v1438_v17 = vmul.f32 %v920_v56, %v920_v56  ;;  %857 = vst.msk [vmem:[#allocation2 + $0x58] sm:$0xff] %vm18_vm0, %v792_v7  ;;  %v2376_v41 = vld [vmem:[#allocation2 + $0x118] sm:$0xff]  ;;  %v2384_v46 = vld [vmem:[#allocation2 + $0x108] sm:$0xff]  ;;  %v99_v52 = vld [vmem:[#allocation2 + $0x80] sm:$0xff] }
  0xf9   :  { %1241 = vst.msk [vmem:[%s3068_s2 + $0x1c] sm:$0xf] %vm1233_vm3, %v1778_v60  ;;  %1239 = vst.msk [vmem:[%s3068_s2 + $0x14] sm:$0xf] %vm1233_vm3, %v1776_v2  ;;  %v1890_v12 = vpop.f32.mrb[12].mxu0  ;;  %v1506_v30 = vsel %vm18_vm0, %v1437_v0, 0.0  ;;  %v1806_v53 = vpack.c.bf16 %v2376_v41, %v2376_v41 }
  0xfa   :  { %v1504_v18 = vsel %vm18_vm0, %v1436_v6, 0.0  ;;  %v795_v19 = vadd.f32 %v1890_v12, %v97_v3  ;;  %v574_v20 = vpop.f32.mrb[13].mxu0  ;;  %v1310_v22 = vadd.f32 %v1309_v16, %v1308_v10  ;;  %855 = vst.msk [vmem:[#allocation2 + $0x48] sm:$0xff] %vm18_vm0, %v790_v11  ;;  %v1311_v31 = vsel %vm18_vm0, %v920_v56, 0.0  ;;  %v2396_v57 = vpop.f32.mrb[12].mxu1 }
  0xfb   :  { %v1505_v23 = vadd.f32 %v1504_v18, %v1503_v4  ;;  %v2352_v24 = vld [vmem:[#allocation2 + $0x50] sm:$0xff]  ;;  %v793_v25 = vadd.f32 %v574_v20, %v95_v8  ;;  %v1891_v26 = vpop.f32.mrb[14].mxu0  ;;  %v1508_v42 = vsel %vm18_vm0, %v1438_v17, 0.0  ;;  %v1804_v56 = vpack.c.bf16 %v2384_v46, %v2384_v46  ;;  %1269 = vst.msk [vmem:[%s3068_s2 + $0x8c] sm:$0xf] %vm1233_vm3, %v1806_v53  ;;  %v2404_v1 = vpop.f32.mrb[13].mxu1 }
  0xfc   :  { %v1781_v32 = vpack.c.bf16 %v2352_v24, %v2352_v24  ;;  %v921_v33 = vld [vmem:[#allocation2 + $0x40] sm:$0xff]  ;;  %860 = vst.msk [vmem:[#allocation2 + $0x70] sm:$0xff] %vm18_vm0, %v795_v19  ;;  %v796_v34 = vadd.f32 %v1891_v26, %v98_v13  ;;  %v577_v35 = vpop.f32.mrb[15].mxu0  ;;  %v1312_v39 = vadd.f32 %v1311_v31, %v1310_v22  ;;  %v1441_v58 = vmul.f32 %v2352_v24, %v2352_v24  ;;  %v2413_v8 = vpop.f32.mrb[14].mxu1 }
  0xfd   :  { %v1507_v37 = vadd.f32 %v1506_v30, %v1505_v23  ;;  %v1779_v38 = vpack.c.bf16 %v921_v33, %v921_v33  ;;  %v1313_v40 = vsel %vm18_vm0, %v921_v33, 0.0  ;;  %858 = vst.msk [vmem:[#allocation2 + $0x60] sm:$0xff] %vm18_vm0, %v793_v25  ;;  %v1439_v43 = vmul.f32 %v921_v33, %v921_v33  ;;  %v2422_v17 = vpop.f32.mrb[15].mxu1 }
  0xfe   :  { %1244 = vst.msk [vmem:[%s3068_s2 + $0x28] sm:$0xf] %vm1233_vm3, %v1781_v32  ;;  %v794_v44 = vadd.f32 %v577_v35, %v96_v27  ;;  %v1314_v49 = vadd.f32 %v1313_v40, %v1312_v39  ;;  %1267 = vst.msk [vmem:[%s3068_s2 + $0x84] sm:$0xf] %vm1233_vm3, %v1804_v56  ;;  %v1317_v18 = vsel %vm18_vm0, %v2352_v24, 0.0  ;;  %v100_v27 = vld [vmem:[#allocation2 + $0x88] sm:$0xff] }
  0xff   :  { %861 = vst.msk [vmem:[#allocation2 + $0x78] sm:$0xff] %vm18_vm0, %v796_v34  ;;  %v1509_v47 = vadd.f32 %v1508_v42, %v1507_v37  ;;  %v1510_v50 = vsel %vm18_vm0, %v1439_v43, 0.0  ;;  %v924_v54 = vld [vmem:[#allocation2 + $0x58] sm:$0xff]  ;;  %v1514_v28 = vsel %vm18_vm0, %v1441_v58, 0.0  ;;  %v105_v34 = vld [vmem:[#allocation2 + $0xb0] sm:$0xff]  ;;  %v103_v40 = vld [vmem:[#allocation2 + $0xa0] sm:$0xff] }
 0x100   :  { %1242 = vst.msk [vmem:[%s3068_s2 + $0x20] sm:$0xf] %vm1233_vm3, %v1779_v38  ;;  %v1782_v60 = vpack.c.bf16 %v924_v54, %v924_v54  ;;  %v1442_v10 = vmul.f32 %v924_v54, %v924_v54  ;;  %v1319_v30 = vsel %vm18_vm0, %v924_v54, 0.0  ;;  %v2452_v42 = vld [vmem:[#allocation2 + $0x130] sm:$0xff] }
 0x101   :  { %859 = vst.msk [vmem:[#allocation2 + $0x68] sm:$0xff] %vm18_vm0, %v794_v44  ;;  %v1894_v55 = vpop.f32.mrb[16].mxu0  ;;  %v1511_v59 = vadd.f32 %v1510_v50, %v1509_v47  ;;  %v922_v61 = vld [vmem:[#allocation2 + $0x48] sm:$0xff]  ;;  %v2457_v50 = vpop.f32.mrb[16].mxu1 }
 0x102   :  { %v799_v62 = vadd.f32 %v1894_v55, %v101_v48  ;;  %v590_v0 = vpop.f32.mrb[17].mxu0  ;;  %v1780_v2 = vpack.c.bf16 %v922_v61, %v922_v61  ;;  %v1315_v3 = vsel %vm18_vm0, %v922_v61, 0.0  ;;  %v1440_v4 = vmul.f32 %v922_v61, %v922_v61  ;;  %1245 = vst.msk [vmem:[%s3068_s2 + $0x2c] sm:$0xf] %vm1233_vm3, %v1782_v60  ;;  %v2463_v56 = vpop.f32.mrb[17].mxu1 }
 0x103   :  { %v2407_v5 = vld [vmem:[#allocation2 + $0x70] sm:$0xff]  ;;  %v797_v6 = vadd.f32 %v590_v0, %v99_v52  ;;  %v1895_v7 = vpop.f32.mrb[18].mxu0  ;;  %v1316_v11 = vadd.f32 %v1315_v3, %v1314_v49  ;;  %v1516_v35 = vsel %vm18_vm0, %v1442_v10, 0.0  ;;  %v1809_v3 = vpack.c.bf16 %v2452_v42, %v2452_v42 }
 0x104   :  { %v1785_v12 = vpack.c.bf16 %v2407_v5, %v2407_v5  ;;  %v925_v13 = vld [vmem:[#allocation2 + $0x60] sm:$0xff]  ;;  %864 = vst.msk [vmem:[#allocation2 + $0x90] sm:$0xff] %vm18_vm0, %v799_v62  ;;  %v593_v16 = vpop.f32.mrb[19].mxu0  ;;  %v1512_v19 = vsel %vm18_vm0, %v1440_v4, 0.0  ;;  %v800_v33 = vadd.f32 %v1895_v7, %v102_v14  ;;  %v1445_v58 = vmul.f32 %v2407_v5, %v2407_v5  ;;  %v106_v62 = vld [vmem:[#allocation2 + $0xb8] sm:$0xff]  ;;  %v2473_v4 = vpop.f32.mrb[18].mxu1 }
 0x105   :  { %1243 = vst.msk [vmem:[%s3068_s2 + $0x24] sm:$0xf] %vm1233_vm3, %v1780_v2  ;;  %v1783_v20 = vpack.c.bf16 %v925_v13, %v925_v13  ;;  %v1318_v23 = vadd.f32 %v1317_v18, %v1316_v11  ;;  %v1513_v25 = vadd.f32 %v1512_v19, %v1511_v59  ;;  %v1443_v24 = vmul.f32 %v925_v13, %v925_v13  ;;  %v104_v2 = vld [vmem:[#allocation2 + $0xa8] sm:$0xff] }
 0x106   :  { %v2431_v22 = vld [vmem:[#allocation2 + $0x78] sm:$0xff]  ;;  %862 = vst.msk [vmem:[#allocation2 + $0x80] sm:$0xff] %vm18_vm0, %v797_v6  ;;  %v1321_v31 = vsel %vm18_vm0, %v925_v13, 0.0  ;;  %865 = vst.msk [vmem:[#allocation2 + $0x98] sm:$0xff] %vm18_vm0, %v800_v33  ;;  %v798_v48 = vadd.f32 %v593_v16, %v100_v27  ;;  %v2478_v13 = vpop.f32.mrb[19].mxu1  ;;  %v1325_v14 = vsel %vm18_vm0, %v2407_v5, 0.0 }
 0x107   :  { %1248 = vst.msk [vmem:[%s3068_s2 + $0x38] sm:$0xf] %vm1233_vm3, %v1785_v12  ;;  %v1786_v26 = vpack.c.bf16 %v2431_v22, %v2431_v22  ;;  %1246 = vst.msk [vmem:[%s3068_s2 + $0x30] sm:$0xf] %vm1233_vm3, %v1783_v20  ;;  %v1515_v37 = vadd.f32 %v1514_v28, %v1513_v25  ;;  %v1320_v38 = vadd.f32 %v1319_v30, %v1318_v23  ;;  %v1518_v43 = vsel %vm18_vm0, %v1443_v24, 0.0  ;;  %v2489_v20 = vld [vmem:[#allocation2 + $0x120] sm:$0xff] }
 0x108   :  { %v926_v32 = vld [vmem:[#allocation2 + $0x68] sm:$0xff]  ;;  %863 = vst.msk [vmem:[#allocation2 + $0x88] sm:$0xff] %vm18_vm0, %v798_v48  ;;  %v1446_v16 = vmul.f32 %v2431_v22, %v2431_v22  ;;  %v1327_v27 = vsel %vm18_vm0, %v2431_v22, 0.0  ;;  %v109_v30 = vld [vmem:[#allocation2 + $0xd0] sm:$0xff] }
 0x109   :  { %1249 = vst.msk [vmem:[%s3068_s2 + $0x3c] sm:$0xf] %vm1233_vm3, %v1786_v26  ;;  %v1784_v39 = vpack.c.bf16 %v926_v32, %v926_v32  ;;  %v1323_v44 = vsel %vm18_vm0, %v926_v32, 0.0  ;;  %v1444_v47 = vmul.f32 %v926_v32, %v926_v32  ;;  %v1898_v49 = vpop.f32.mrb[20].mxu0  ;;  %v1322_v52 = vadd.f32 %v1321_v31, %v1320_v38  ;;  %1272 = vst.msk [vmem:[%s3068_s2 + $0x98] sm:$0xf] %vm1233_vm3, %v1809_v3 }
 0x10a   :  { %v1517_v53 = vadd.f32 %v1516_v35, %v1515_v37  ;;  %v803_v54 = vadd.f32 %v1898_v49, %v105_v34  ;;  %v606_v55 = vpop.f32.mrb[21].mxu0  ;;  %v1522_v26 = vsel %vm18_vm0, %v1445_v58, 0.0  ;;  %v1807_v34 = vpack.c.bf16 %v2489_v20, %v2489_v20 }
 0x10b   :  { %1247 = vst.msk [vmem:[%s3068_s2 + $0x34] sm:$0xf] %vm1233_vm3, %v1784_v39  ;;  %v1520_v59 = vsel %vm18_vm0, %v1444_v47, 0.0  ;;  %v2468_v60 = vld [vmem:[#allocation2 + $0x90] sm:$0xff]  ;;  %v801_v61 = vadd.f32 %v606_v55, %v103_v40  ;;  %v1899_v0 = vpop.f32.mrb[22].mxu0  ;;  %v1324_v7 = vadd.f32 %v1323_v44, %v1322_v52  ;;  %v1524_v22 = vsel %vm18_vm0, %v1446_v16, 0.0 }
 0x10c   :  { %v1519_v6 = vadd.f32 %v1518_v43, %v1517_v53  ;;  %v1789_v10 = vpack.c.bf16 %v2468_v60, %v2468_v60  ;;  %868 = vst.msk [vmem:[#allocation2 + $0xb0] sm:$0xff] %vm18_vm0, %v803_v54  ;;  %v609_v12 = vpop.f32.mrb[23].mxu0  ;;  %v804_v5 = vadd.f32 %v1899_v0, %v106_v62  ;;  %v1449_v35 = vmul.f32 %v2468_v60, %v2468_v60  ;;  %v2511_v40 = vpop.f32.mrb[20].mxu1 }
 0x10d   :  { %v929_v11 = vld [vmem:[#allocation2 + $0x80] sm:$0xff]  ;;  %866 = vst.msk [vmem:[#allocation2 + $0xa0] sm:$0xff] %vm18_vm0, %v801_v61  ;;  %v1326_v23 = vadd.f32 %v1325_v14, %v1324_v7  ;;  %v802_v24 = vadd.f32 %v609_v12, %v104_v2  ;;  %v932_v33 = vld [vmem:[#allocation2 + $0x98] sm:$0xff]  ;;  %v2517_v52 = vpop.f32.mrb[21].mxu1  ;;  %v1333_v16 = vsel %vm18_vm0, %v2468_v60, 0.0 }
 0x10e   :  { %v1787_v18 = vpack.c.bf16 %v929_v11, %v929_v11  ;;  %v1447_v19 = vmul.f32 %v929_v11, %v929_v11  ;;  %v1521_v25 = vadd.f32 %v1520_v59, %v1519_v6  ;;  %1252 = vst.msk [vmem:[%s3068_s2 + $0x48] sm:$0xf] %vm1233_vm3, %v1789_v10  ;;  %v1329_v28 = vsel %vm18_vm0, %v929_v11, 0.0  ;;  %1270 = vst.msk [vmem:[%s3068_s2 + $0x90] sm:$0xf] %vm1233_vm3, %v1807_v34  ;;  %v107_v59 = vld [vmem:[#allocation2 + $0xc0] sm:$0xff] }
 0x10f   :  { %v1328_v32 = vadd.f32 %v1327_v27, %v1326_v23  ;;  %869 = vst.msk [vmem:[#allocation2 + $0xb8] sm:$0xff] %vm18_vm0, %v804_v5  ;;  %867 = vst.msk [vmem:[#allocation2 + $0xa8] sm:$0xff] %vm18_vm0, %v802_v24  ;;  %v1790_v38 = vpack.c.bf16 %v932_v33, %v932_v33  ;;  %v930_v47 = vld [vmem:[#allocation2 + $0x88] sm:$0xff]  ;;  %v2524_v62 = vpop.f32.mrb[22].mxu1  ;;  %v1450_v2 = vmul.f32 %v932_v33, %v932_v33  ;;  %v110_v10 = vld [vmem:[#allocation2 + $0xd8] sm:$0xff]  ;;  %v1335_v60 = vsel %vm18_vm0, %v932_v33, 0.0 }
 0x110   :  { %1250 = vst.msk [vmem:[%s3068_s2 + $0x40] sm:$0xf] %vm1233_vm3, %v1787_v18  ;;  %v1523_v31 = vadd.f32 %v1522_v26, %v1521_v25  ;;  %v1526_v37 = vsel %vm18_vm0, %v1447_v19, 0.0  ;;  %v1788_v53 = vpack.c.bf16 %v930_v47, %v930_v47  ;;  %v1331_v54 = vsel %vm18_vm0, %v930_v47, 0.0  ;;  %v108_v11 = vld [vmem:[#allocation2 + $0xc8] sm:$0xff]  ;;  %v2527_v14 = vpop.f32.mrb[23].mxu1 }
 0x111   :  { %v1902_v39 = vpop.f32.mrb[24].mxu0  ;;  %v1330_v43 = vadd.f32 %v1329_v28, %v1328_v32  ;;  %1253 = vst.msk [vmem:[%s3068_s2 + $0x4c] sm:$0xf] %vm1233_vm3, %v1790_v38  ;;  %v1448_v55 = vmul.f32 %v930_v47, %v930_v47  ;;  %v1530_v18 = vsel %vm18_vm0, %v1449_v35, 0.0  ;;  %v113_v34 = vld [vmem:[#allocation2 + $0xf0] sm:$0xff]  ;;  %v111_v33 = vld [vmem:[#allocation2 + $0xe0] sm:$0xff] }
 0x112   :  { %v1525_v44 = vadd.f32 %v1524_v22, %v1523_v31  ;;  %v807_v48 = vadd.f32 %v1902_v39, %v109_v30  ;;  %v622_v49 = vpop.f32.mrb[25].mxu0  ;;  %1251 = vst.msk [vmem:[%s3068_s2 + $0x44] sm:$0xf] %vm1233_vm3, %v1788_v53  ;;  %v1532_v22 = vsel %vm18_vm0, %v1450_v2, 0.0  ;;  %v122_v39 = vld [vmem:[#allocation2 + $0x138] sm:$0xff]  ;;  %v2553_v53 = vpop.f32.mrb[24].mxu1 }
 0x113   :  { %v935_v58 = vld [vmem:[#allocation2 + $0xb0] sm:$0xff]  ;;  %v1903_v61 = vpop.f32.mrb[26].mxu0  ;;  %v1332_v3 = vadd.f32 %v1331_v54, %v1330_v43  ;;  %v1528_v19 = vsel %vm18_vm0, %v1448_v55, 0.0  ;;  %v805_v26 = vadd.f32 %v622_v49, %v107_v59  ;;  %v114_v2 = vld [vmem:[#allocation2 + $0xf8] sm:$0xff] }
 0x114   :  { %v1527_v0 = vadd.f32 %v1526_v37, %v1525_v44  ;;  %v1793_v6 = vpack.c.bf16 %v935_v58, %v935_v58  ;;  %v933_v7 = vld [vmem:[#allocation2 + $0xa0] sm:$0xff]  ;;  %872 = vst.msk [vmem:[#allocation2 + $0xd0] sm:$0xff] %vm18_vm0, %v807_v48  ;;  %v625_v12 = vpop.f32.mrb[27].mxu0  ;;  %v808_v31 = vadd.f32 %v1903_v61, %v110_v10  ;;  %v1453_v43 = vmul.f32 %v935_v58, %v935_v58 }
 0x115   :  { %v1791_v23 = vpack.c.bf16 %v933_v7, %v933_v7  ;;  %v1334_v25 = vadd.f32 %v1333_v16, %v1332_v3  ;;  %v1451_v24 = vmul.f32 %v933_v7, %v933_v7  ;;  %v1337_v27 = vsel %vm18_vm0, %v933_v7, 0.0  ;;  %870 = vst.msk [vmem:[#allocation2 + $0xc0] sm:$0xff] %vm18_vm0, %v805_v26  ;;  %v112_v3 = vld [vmem:[#allocation2 + $0xe8] sm:$0xff] }
 0x116   :  { %v1529_v5 = vadd.f32 %v1528_v19, %v1527_v0  ;;  %1256 = vst.msk [vmem:[%s3068_s2 + $0x58] sm:$0xf] %vm1233_vm3, %v1793_v6  ;;  %v936_v28 = vld [vmem:[#allocation2 + $0xb8] sm:$0xff]  ;;  %v934_v30 = vld [vmem:[#allocation2 + $0xa8] sm:$0xff]  ;;  %v806_v32 = vadd.f32 %v625_v12, %v108_v11  ;;  %v2559_v6 = vpop.f32.mrb[25].mxu1  ;;  %v1341_v7 = vsel %vm18_vm0, %v935_v58, 0.0  ;;  %v820_v16 = vadd.f32 %v2311_v45, %v122_v39 }
 0x117   :  { %1254 = vst.msk [vmem:[%s3068_s2 + $0x50] sm:$0xf] %vm1233_vm3, %v1791_v23  ;;  %v1336_v37 = vadd.f32 %v1335_v60, %v1334_v25  ;;  %v1794_v38 = vpack.c.bf16 %v936_v28, %v936_v28  ;;  %v1534_v44 = vsel %vm18_vm0, %v1451_v24, 0.0  ;;  %v1792_v47 = vpack.c.bf16 %v934_v30, %v934_v30  ;;  %v125_v19 = vld [vmem:[#allocation2 + $0x150] sm:$0xff]  ;;  %v2569_v23 = vpop.f32.mrb[26].mxu1  ;;  %v123_v60 = vld [vmem:[#allocation2 + $0x140] sm:$0xff] }
 0x118   :  { %v1531_v35 = vadd.f32 %v1530_v18, %v1529_v5  ;;  %v1339_v48 = vsel %vm18_vm0, %v934_v30, 0.0  ;;  %873 = vst.msk [vmem:[#allocation2 + $0xd8] sm:$0xff] %vm18_vm0, %v808_v31  ;;  %871 = vst.msk [vmem:[#allocation2 + $0xc8] sm:$0xff] %vm18_vm0, %v806_v32  ;;  %v1452_v59 = vmul.f32 %v934_v30, %v934_v30  ;;  %v120_v18 = vld [vmem:[#allocation2 + $0x128] sm:$0xff]  ;;  %v2575_v31 = vpop.f32.mrb[27].mxu1  ;;  %v1538_v45 = vsel %vm18_vm0, %v1453_v43, 0.0 }
 0x119   :  { %v1906_v49 = vpop.f32.mrb[28].mxu0  ;;  %v1338_v54 = vadd.f32 %v1337_v27, %v1336_v37  ;;  %1257 = vst.msk [vmem:[%s3068_s2 + $0x5c] sm:$0xf] %vm1233_vm3, %v1794_v38  ;;  %1255 = vst.msk [vmem:[%s3068_s2 + $0x54] sm:$0xf] %vm1233_vm3, %v1792_v47  ;;  %v126_v27 = vld [vmem:[#allocation2 + $0x158] sm:$0xff]  ;;  %v1454_v32 = vmul.f32 %v936_v28, %v936_v28  ;;  %v818_v38 = vadd.f32 %v2315_v51, %v120_v18 }
 0x11a   :  { %v1533_v55 = vadd.f32 %v1532_v22, %v1531_v35  ;;  %v811_v61 = vadd.f32 %v1906_v49, %v113_v34  ;;  %v638_v0 = vpop.f32.mrb[29].mxu0  ;;  %v1536_v24 = vsel %vm18_vm0, %v1452_v59, 0.0  ;;  %v124_v30 = vld [vmem:[#allocation2 + $0x148] sm:$0xff]  ;;  %885 = vst.msk [vmem:[#allocation2 + $0x138] sm:$0xff] %vm18_vm0, %v820_v16  ;;  %v1343_v39 = vsel %vm18_vm0, %v936_v28, 0.0  ;;  %v129_v28 = vld [vmem:[#allocation2 + $0x170] sm:$0xff] }
 0x11b   :  { %v2566_v10 = vld [vmem:[#allocation2 + $0xd0] sm:$0xff]  ;;  %v809_v11 = vadd.f32 %v638_v0, %v111_v33  ;;  %v1907_v12 = vpop.f32.mrb[30].mxu0  ;;  %v1340_v5 = vadd.f32 %v1339_v48, %v1338_v54  ;;  %v823_v33 = vadd.f32 %v2345_v15, %v125_v19  ;;  %v824_v47 = vadd.f32 %v2361_v29, %v126_v27  ;;  %883 = vst.msk [vmem:[#allocation2 + $0x128] sm:$0xff] %vm18_vm0, %v818_v38  ;;  %v2599_v29 = vpop.f32.mrb[28].mxu1 }
 0x11c   :  { %v1535_v25 = vadd.f32 %v1534_v44, %v1533_v55  ;;  %v1797_v58 = vpack.c.bf16 %v2566_v10, %v2566_v10  ;;  %876 = vst.msk [vmem:[#allocation2 + $0xf0] sm:$0xff] %vm18_vm0, %v811_v61  ;;  %v641_v26 = vpop.f32.mrb[31].mxu0  ;;  %v812_v34 = vadd.f32 %v1907_v12, %v114_v2  ;;  %v937_v43 = vld [vmem:[#allocation2 + $0xc0] sm:$0xff]  ;;  %v821_v44 = vadd.f32 %v2350_v21, %v123_v60 }
 0x11d   :  { %874 = vst.msk [vmem:[#allocation2 + $0xe0] sm:$0xff] %vm18_vm0, %v809_v11  ;;  %v810_v22 = vadd.f32 %v641_v26, %v112_v3  ;;  %v1342_v35 = vadd.f32 %v1341_v7, %v1340_v5  ;;  %v822_v48 = vadd.f32 %v2368_v36, %v124_v30  ;;  %v1795_v54 = vpack.c.bf16 %v937_v43, %v937_v43  ;;  %v2606_v11 = vpop.f32.mrb[29].mxu1 }
 0x11e   :  { %v1537_v37 = vadd.f32 %v1536_v24, %v1535_v25  ;;  %1260 = vst.msk [vmem:[%s3068_s2 + $0x68] sm:$0xf] %vm1233_vm3, %v1797_v58  ;;  %v1345_v51 = vsel %vm18_vm0, %v937_v43, 0.0  ;;  %v1540_v61 = vsel %vm18_vm0, %v1454_v32, 0.0  ;;  %v1455_v0 = vmul.f32 %v937_v43, %v937_v43  ;;  %v2616_v5 = vpop.f32.mrb[30].mxu1 }
 0x11f   :  { %877 = vst.msk [vmem:[#allocation2 + $0xf8] sm:$0xff] %vm18_vm0, %v812_v34  ;;  %875 = vst.msk [vmem:[#allocation2 + $0xe8] sm:$0xff] %vm18_vm0, %v810_v22  ;;  %v1344_v55 = vadd.f32 %v1343_v39, %v1342_v35  ;;  %v940_v59 = vld [vmem:[#allocation2 + $0xd8] sm:$0xff]  ;;  %v938_v15 = vld [vmem:[#allocation2 + $0xc8] sm:$0xff]  ;;  %v1457_v12 = vmul.f32 %v2566_v10, %v2566_v10  ;;  %v827_v25 = vadd.f32 %v2396_v57, %v129_v28  ;;  %v2624_v30 = vpop.f32.mrb[31].mxu1 }
 0x120   :  { %v1539_v49 = vadd.f32 %v1538_v45, %v1537_v37  ;;  %888 = vst.msk [vmem:[#allocation2 + $0x150] sm:$0xff] %vm18_vm0, %v823_v33  ;;  %v1798_v21 = vpack.c.bf16 %v940_v59, %v940_v59  ;;  %886 = vst.msk [vmem:[#allocation2 + $0x140] sm:$0xff] %vm18_vm0, %v821_v44  ;;  %v1796_v3 = vpack.c.bf16 %v938_v15, %v938_v15  ;;  %v1347_v7 = vsel %vm18_vm0, %v938_v15, 0.0 }
 0x121   :  { %889 = vst.msk [vmem:[#allocation2 + $0x158] sm:$0xff] %vm18_vm0, %v824_v47  ;;  %887 = vst.msk [vmem:[#allocation2 + $0x148] sm:$0xff] %vm18_vm0, %v822_v48  ;;  %v1346_v36 = vadd.f32 %v1345_v51, %v1344_v55  ;;  %v1542_v16 = vsel %vm18_vm0, %v1455_v0, 0.0  ;;  %v1456_v18 = vmul.f32 %v938_v15, %v938_v15  ;;  %v2622_v27 = vld [vmem:[#allocation2 + $0x138] sm:$0xff]  ;;  %v1349_v45 = vsel %vm18_vm0, %v2566_v10, 0.0 }
 0x122   :  { %1258 = vst.msk [vmem:[%s3068_s2 + $0x60] sm:$0xf] %vm1233_vm3, %v1795_v54  ;;  %v1541_v2 = vadd.f32 %v1540_v61, %v1539_v49  ;;  %1261 = vst.msk [vmem:[%s3068_s2 + $0x6c] sm:$0xf] %vm1233_vm3, %v1798_v21  ;;  %v1458_v32 = vmul.f32 %v940_v59, %v940_v59  ;;  %v1810_v39 = vpack.c.bf16 %v2622_v27, %v2622_v27  ;;  %v1546_v10 = vsel %vm18_vm0, %v1457_v12, 0.0  ;;  %v2643_v48 = vld [vmem:[#allocation2 + $0x128] sm:$0xff] }
 0x123   :  { %v943_v19 = vld [vmem:[#allocation2 + $0xf0] sm:$0xff]  ;;  %1259 = vst.msk [vmem:[%s3068_s2 + $0x64] sm:$0xf] %vm1233_vm3, %v1796_v3  ;;  %v1348_v58 = vadd.f32 %v1347_v7, %v1346_v36  ;;  %v1544_v57 = vsel %vm18_vm0, %v1456_v18, 0.0  ;;  %v1351_v43 = vsel %vm18_vm0, %v940_v59, 0.0  ;;  %v1465_v51 = vmul.f32 %v2325_v63, %v2325_v63 }
 0x124   :  { %v1543_v24 = vadd.f32 %v1542_v16, %v1541_v2  ;;  %v1801_v26 = vpack.c.bf16 %v943_v19, %v943_v19  ;;  %v941_v60 = vld [vmem:[#allocation2 + $0xe0] sm:$0xff]  ;;  %892 = vst.msk [vmem:[#allocation2 + $0x170] sm:$0xff] %vm18_vm0, %v827_v25  ;;  %v1548_v15 = vsel %vm18_vm0, %v1458_v32, 0.0  ;;  %v1808_v2 = vpack.c.bf16 %v2643_v48, %v2643_v48 }
 0x125   :  { %v1799_v34 = vpack.c.bf16 %v941_v60, %v941_v60  ;;  %v1350_v22 = vadd.f32 %v1349_v45, %v1348_v58  ;;  %v1459_v37 = vmul.f32 %v941_v60, %v941_v60  ;;  %v1353_v44 = vsel %vm18_vm0, %v941_v60, 0.0  ;;  %1273 = vst.msk [vmem:[%s3068_s2 + $0x9c] sm:$0xf] %vm1233_vm3, %v1810_v39 }
 0x126   :  { %v1545_v35 = vadd.f32 %v1544_v57, %v1543_v24  ;;  %1264 = vst.msk [vmem:[%s3068_s2 + $0x78] sm:$0xf] %vm1233_vm3, %v1801_v26  ;;  %v944_v38 = vld [vmem:[#allocation2 + $0xf8] sm:$0xff]  ;;  %v942_v33 = vld [vmem:[#allocation2 + $0xe8] sm:$0xff]  ;;  %v1461_v7 = vmul.f32 %v943_v19, %v943_v19  ;;  %v2671_v16 = vsel %vm18_vm0, %v2325_v63, 0.0  ;;  %v2678_v26 = vsel %vm18_vm0, %v1465_v51, 0.0 }
 0x127   :  { %1262 = vst.msk [vmem:[%s3068_s2 + $0x70] sm:$0xf] %vm1233_vm3, %v1799_v34  ;;  %v1802_v47 = vpack.c.bf16 %v944_v38, %v944_v38  ;;  %v1352_v54 = vadd.f32 %v1351_v43, %v1350_v22  ;;  %v1800_v55 = vpack.c.bf16 %v942_v33, %v942_v33  ;;  %v2651_v59 = vld [vmem:[#allocation2 + $0x150] sm:$0xff]  ;;  %v1550_v28 = vsel %vm18_vm0, %v1459_v37, 0.0  ;;  %v2666_v3 = vld [vmem:[#allocation2 + $0x140] sm:$0xff] }
 0x128   :  { %v1547_v49 = vadd.f32 %v1546_v10, %v1545_v35  ;;  %v1355_v61 = vsel %vm18_vm0, %v942_v33, 0.0  ;;  %v1460_v0 = vmul.f32 %v942_v33, %v942_v33  ;;  %v1813_v18 = vpack.c.bf16 %v2651_v59, %v2651_v59  ;;  %v2675_v25 = vld [vmem:[#allocation2 + $0x158] sm:$0xff]  ;;  %1271 = vst.msk [vmem:[%s3068_s2 + $0x94] sm:$0xf] %vm1233_vm3, %v1808_v2  ;;  %v2686_v63 = vld [vmem:[#allocation2 + $0x148] sm:$0xff] }
 0x129   :  { %1265 = vst.msk [vmem:[%s3068_s2 + $0x7c] sm:$0xf] %vm1233_vm3, %v1802_v47  ;;  %v1354_v21 = vadd.f32 %v1353_v44, %v1352_v54  ;;  %1263 = vst.msk [vmem:[%s3068_s2 + $0x74] sm:$0xf] %vm1233_vm3, %v1800_v55  ;;  %v1463_v60 = vmul.f32 %v2337_v9, %v2337_v9  ;;  %v1357_v45 = vsel %vm18_vm0, %v943_v19, 0.0  ;;  %v1462_v32 = vmul.f32 %v944_v38, %v944_v38  ;;  %v127_v47 = vld [vmem:[#allocation2 + $0x160] sm:$0xff] }
 0x12a   :  { %v1549_v36 = vadd.f32 %v1548_v15, %v1547_v49  ;;  %v1552_v12 = vsel %vm18_vm0, %v1460_v0, 0.0  ;;  %v1466_v57 = vmul.f32 %v2376_v41, %v2376_v41  ;;  %1276 = vst.msk [vmem:[%s3068_s2 + $0xa8] sm:$0xf] %vm1233_vm3, %v1813_v18  ;;  %v1811_v34 = vpack.c.bf16 %v2666_v3, %v2666_v3  ;;  %v133_v15 = vld [vmem:[#allocation2 + $0x190] sm:$0xff] }
 0x12b   :  { %v1356_v58 = vadd.f32 %v1355_v61, %v1354_v21  ;;  %v1464_v37 = vmul.f32 %v2384_v46, %v2384_v46  ;;  %v1814_v19 = vpack.c.bf16 %v2675_v25, %v2675_v25  ;;  %v2701_v33 = vld [vmem:[#allocation2 + $0x170] sm:$0xff]  ;;  %v1554_v39 = vsel %vm18_vm0, %v1461_v7, 0.0  ;;  %v131_v21 = vld [vmem:[#allocation2 + $0x180] sm:$0xff] }
 0x12c   :  { %v1551_v24 = vadd.f32 %v1550_v28, %v1549_v36  ;;  %v1359_v10 = vsel %vm18_vm0, %v944_v38, 0.0  ;;  %v1361_v43 = vsel %vm18_vm0, %v2337_v9, 0.0  ;;  %1274 = vst.msk [vmem:[%s3068_s2 + $0xa0] sm:$0xf] %vm1233_vm3, %v1811_v34  ;;  %v1812_v44 = vpack.c.bf16 %v2686_v63, %v2686_v63  ;;  %v130_v9 = vld [vmem:[#allocation2 + $0x178] sm:$0xff]  ;;  %v128_v38 = vld [vmem:[#allocation2 + $0x168] sm:$0xff] }
 0x12d   :  { %v1358_v22 = vadd.f32 %v1357_v45, %v1356_v58  ;;  %v1558_v55 = vsel %vm18_vm0, %v1463_v60, 0.0  ;;  %v1367_v51 = vsel %vm18_vm0, %v2376_v41, 0.0  ;;  %1277 = vst.msk [vmem:[%s3068_s2 + $0xac] sm:$0xf] %vm1233_vm3, %v1814_v19  ;;  %v1556_v28 = vsel %vm18_vm0, %v1462_v32, 0.0  ;;  %v134_v36 = vld [vmem:[#allocation2 + $0x198] sm:$0xff] }
 0x12e   :  { %v1553_v35 = vadd.f32 %v1552_v12, %v1551_v24  ;;  %v2722_v61 = vsel %vm18_vm0, %v1466_v57, 0.0  ;;  %v1363_v0 = vsel %vm18_vm0, %v2384_v46, 0.0  ;;  %1275 = vst.msk [vmem:[%s3068_s2 + $0xa4] sm:$0xf] %vm1233_vm3, %v1812_v44  ;;  %v1817_v41 = vpack.c.bf16 %v2701_v33, %v2701_v33  ;;  %v132_v24 = vld [vmem:[#allocation2 + $0x188] sm:$0xff]  ;;  %v137_v58 = vld [vmem:[#allocation2 + $0x1b0] sm:$0xff] }
 0x12f   :  { %v1360_v54 = vadd.f32 %v1359_v10, %v1358_v22  ;;  %v1560_v12 = vsel %vm18_vm0, %v1464_v37, 0.0  ;;  %v825_v18 = vadd.f32 %v2404_v1, %v127_v47  ;;  %v135_v60 = vld [vmem:[#allocation2 + $0x1a0] sm:$0xff]  ;;  %v1369_v46 = vsel %vm18_vm0, %v2489_v20, 0.0  ;;  %v138_v34 = vld [vmem:[#allocation2 + $0x1b8] sm:$0xff]  ;;  %v136_v22 = vld [vmem:[#allocation2 + $0x1a8] sm:$0xff] }
 0x130   :  { %v1555_v49 = vadd.f32 %v1554_v39, %v1553_v35  ;;  %1280 = vst.msk [vmem:[%s3068_s2 + $0xb8] sm:$0xf] %vm1233_vm3, %v1817_v41  ;;  %v828_v45 = vadd.f32 %v2413_v8, %v130_v9  ;;  %v826_v32 = vadd.f32 %v2422_v17, %v128_v38  ;;  %v831_v57 = vadd.f32 %v2457_v50, %v133_v15  ;;  %v141_v1 = vld [vmem:[#allocation2 + $0x1d0] sm:$0xff]  ;;  %v139_v10 = vld [vmem:[#allocation2 + $0x1c0] sm:$0xff]  ;;  %v140_v44 = vld [vmem:[#allocation2 + $0x1c8] sm:$0xff] }
 0x131   :  { %v1362_v2 = vadd.f32 %v1361_v43, %v1360_v54  ;;  %v1467_v19 = vmul.f32 %v2489_v20, %v2489_v20  ;;  %890 = vst.msk [vmem:[#allocation2 + $0x160] sm:$0xff] %vm18_vm0, %v825_v18  ;;  %v829_v39 = vadd.f32 %v2463_v56, %v131_v21  ;;  %v142_v43 = vld [vmem:[#allocation2 + $0x1d8] sm:$0xff]  ;;  %v832_v8 = vadd.f32 %v2473_v4, %v134_v36  ;;  %v145_v47 = vld [vmem:[#allocation2 + $0x1f0] sm:$0xff]  ;;  %v144_v15 = vld [vmem:[#allocation2 + $0x1e8] sm:$0xff] }
 0x132   :  { %v1557_v7 = vadd.f32 %v1556_v28, %v1555_v49  ;;  %893 = vst.msk [vmem:[#allocation2 + $0x178] sm:$0xff] %vm18_vm0, %v828_v45  ;;  %891 = vst.msk [vmem:[#allocation2 + $0x168] sm:$0xff] %vm18_vm0, %v826_v32  ;;  %v830_v17 = vadd.f32 %v2478_v13, %v132_v24  ;;  %v835_v50 = vadd.f32 %v2511_v40, %v137_v58  ;;  %v143_v49 = vld [vmem:[#allocation2 + $0x1e0] sm:$0xff]  ;;  %v146_v38 = vld [vmem:[#allocation2 + $0x1f8] sm:$0xff]  ;;  %v1375_v45 = vsel %vm18_vm0, %v2622_v27, 0.0 }
 0x133   :  { %v1364_v37 = vadd.f32 %v1363_v0, %v1362_v2  ;;  %896 = vst.msk [vmem:[#allocation2 + $0x190] sm:$0xff] %vm18_vm0, %v831_v57  ;;  %v833_v20 = vadd.f32 %v2517_v52, %v135_v60  ;;  %894 = vst.msk [vmem:[#allocation2 + $0x180] sm:$0xff] %vm18_vm0, %v829_v39  ;;  %v834_v9 = vadd.f32 %v2527_v14, %v136_v22  ;;  %v1566_v0 = vsel %vm18_vm0, %v1467_v19, 0.0 }
 0x134   :  { %v1559_v35 = vadd.f32 %v1558_v55, %v1557_v7  ;;  %v836_v55 = vadd.f32 %v2524_v62, %v138_v34  ;;  %897 = vst.msk [vmem:[#allocation2 + $0x198] sm:$0xff] %vm18_vm0, %v832_v8  ;;  %895 = vst.msk [vmem:[#allocation2 + $0x188] sm:$0xff] %vm18_vm0, %v830_v17  ;;  %v839_v4 = vadd.f32 %v2553_v53, %v141_v1  ;;  %v1377_v32 = vsel %vm18_vm0, %v2666_v3, 0.0 }
 0x135   :  { %v1366_v56 = vadd.f32 %v2671_v16, %v1364_v37  ;;  %900 = vst.msk [vmem:[#allocation2 + $0x1b0] sm:$0xff] %vm18_vm0, %v835_v50  ;;  %898 = vst.msk [vmem:[#allocation2 + $0x1a0] sm:$0xff] %vm18_vm0, %v833_v20  ;;  %v837_v13 = vadd.f32 %v2559_v6, %v139_v10  ;;  %v840_v40 = vadd.f32 %v2569_v23, %v142_v43  ;;  %v1379_v17 = vsel %vm18_vm0, %v2686_v63, 0.0 }
 0x136   :  { %v1561_v54 = vadd.f32 %v1560_v12, %v1559_v35  ;;  %v838_v52 = vadd.f32 %v2575_v31, %v140_v44  ;;  %901 = vst.msk [vmem:[#allocation2 + $0x1b8] sm:$0xff] %vm18_vm0, %v836_v55  ;;  %899 = vst.msk [vmem:[#allocation2 + $0x1a8] sm:$0xff] %vm18_vm0, %v834_v9  ;;  %v843_v16 = vadd.f32 %v2599_v29, %v145_v47  ;;  %v1381_v47 = vsel %vm18_vm0, %v2651_v59, 0.0 }
 0x137   :  { %v1368_v14 = vadd.f32 %v1367_v51, %v1366_v56  ;;  %v841_v28 = vadd.f32 %v2606_v11, %v143_v49  ;;  %v1468_v53 = vmul.f32 %v2643_v48, %v2643_v48  ;;  %904 = vst.msk [vmem:[#allocation2 + $0x1d0] sm:$0xff] %vm18_vm0, %v839_v4  ;;  %902 = vst.msk [vmem:[#allocation2 + $0x1c0] sm:$0xff] %vm18_vm0, %v837_v13 }
 0x138   :  { %v1563_v62 = vadd.f32 %v2678_v26, %v1561_v54  ;;  %905 = vst.msk [vmem:[#allocation2 + $0x1d8] sm:$0xff] %vm18_vm0, %v840_v40  ;;  %903 = vst.msk [vmem:[#allocation2 + $0x1c8] sm:$0xff] %vm18_vm0, %v838_v52  ;;  %v844_v6 = vadd.f32 %v2616_v5, %v146_v38  ;;  %v842_v23 = vadd.f32 %v2624_v30, %v144_v15  ;;  %v1371_v26 = vsel %vm18_vm0, %v2643_v48, 0.0  ;;  %v957_v51 = vld [vmem:[#allocation2 + $0x160] sm:$0xff] }
 0x139   :  { %v1370_v31 = vadd.f32 %v1369_v46, %v1368_v14  ;;  %908 = vst.msk [vmem:[#allocation2 + $0x1f0] sm:$0xff] %vm18_vm0, %v843_v16  ;;  %906 = vst.msk [vmem:[#allocation2 + $0x1e0] sm:$0xff] %vm18_vm0, %v841_v28  ;;  %v1469_v11 = vmul.f32 %v2452_v42, %v2452_v42  ;;  %v1373_v5 = vsel %vm18_vm0, %v2452_v42, 0.0  ;;  %v1815_v41 = vpack.c.bf16 %v957_v51, %v957_v51  ;;  %v2791_v21 = vld [vmem:[#allocation2 + $0x178] sm:$0xff]  ;;  %v2793_v36 = vld [vmem:[#allocation2 + $0x168] sm:$0xff] }
 0x13a   :  { %v1565_v29 = vadd.f32 %v2722_v61, %v1563_v62  ;;  %909 = vst.msk [vmem:[#allocation2 + $0x1f8] sm:$0xff] %vm18_vm0, %v844_v6  ;;  %907 = vst.msk [vmem:[#allocation2 + $0x1e8] sm:$0xff] %vm18_vm0, %v842_v23  ;;  %v2795_v2 = vld [vmem:[#allocation2 + $0x190] sm:$0xff]  ;;  %v1470_v48 = vmul.f32 %v2622_v27, %v2622_v27  ;;  %v1568_v7 = vsel %vm18_vm0, %v1468_v53, 0.0  ;;  %v1471_v12 = vmul.f32 %v2666_v3, %v2666_v3  ;;  %v2810_v60 = vld [vmem:[#allocation2 + $0x180] sm:$0xff] }
 0x13b   :  { %v1372_v61 = vadd.f32 %v1371_v26, %v1370_v31  ;;  %v1818_v42 = vpack.c.bf16 %v2791_v21, %v2791_v21  ;;  %1278 = vst.msk [vmem:[%s3068_s2 + $0xb0] sm:$0xf] %vm1233_vm3, %v1815_v41  ;;  %v1816_v58 = vpack.c.bf16 %v2793_v36, %v2793_v36  ;;  %v1570_v46 = vsel %vm18_vm0, %v1469_v11, 0.0  ;;  %v2823_v34 = vld [vmem:[#allocation2 + $0x198] sm:$0xff]  ;;  %v2829_v27 = vld [vmem:[#allocation2 + $0x188] sm:$0xff] }
 0x13c   :  { %v1567_v30 = vadd.f32 %v1566_v0, %v1565_v29  ;;  %v1821_v57 = vpack.c.bf16 %v2795_v2, %v2795_v2  ;;  %v1572_v3 = vsel %vm18_vm0, %v1470_v48, 0.0  ;;  %v1574_v35 = vsel %vm18_vm0, %v1471_v12, 0.0  ;;  %v2843_v44 = vld [vmem:[#allocation2 + $0x1b0] sm:$0xff]  ;;  %v2855_v20 = vld [vmem:[#allocation2 + $0x1a0] sm:$0xff] }
 0x13d   :  { %v1374_v18 = vadd.f32 %v1373_v5, %v1372_v61  ;;  %1281 = vst.msk [vmem:[%s3068_s2 + $0xbc] sm:$0xf] %vm1233_vm3, %v1818_v42  ;;  %1279 = vst.msk [vmem:[%s3068_s2 + $0xb4] sm:$0xf] %vm1233_vm3, %v1816_v58  ;;  %v1472_v37 = vmul.f32 %v2686_v63, %v2686_v63  ;;  %v1819_v19 = vpack.c.bf16 %v2810_v60, %v2810_v60  ;;  %v2863_v63 = vld [vmem:[#allocation2 + $0x1b8] sm:$0xff]  ;;  %v2876_v13 = vld [vmem:[#allocation2 + $0x1a8] sm:$0xff] }
 0x13e   :  { %v1569_v24 = vadd.f32 %v1568_v7, %v1567_v30  ;;  %1284 = vst.msk [vmem:[%s3068_s2 + $0xc8] sm:$0xf] %vm1233_vm3, %v1821_v57  ;;  %v1822_v43 = vpack.c.bf16 %v2823_v34, %v2823_v34  ;;  %v1473_v8 = vmul.f32 %v2651_v59, %v2651_v59  ;;  %v1820_v50 = vpack.c.bf16 %v2829_v27, %v2829_v27  ;;  %v2888_v16 = vld [vmem:[#allocation2 + $0x1d0] sm:$0xff] }
 0x13f   :  { %v1376_v1 = vadd.f32 %v1375_v45, %v1374_v18  ;;  %1282 = vst.msk [vmem:[%s3068_s2 + $0xc0] sm:$0xf] %vm1233_vm3, %v1819_v19  ;;  %v1474_v54 = vmul.f32 %v2675_v25, %v2675_v25  ;;  %v1576_v55 = vsel %vm18_vm0, %v1472_v37, 0.0  ;;  %v1475_v9 = vmul.f32 %v957_v51, %v957_v51  ;;  %v2920_v41 = vld [vmem:[#allocation2 + $0x1c8] sm:$0xff] }
 0x140   :  { %v1571_v22 = vadd.f32 %v1570_v46, %v1569_v24  ;;  %1285 = vst.msk [vmem:[%s3068_s2 + $0xcc] sm:$0xf] %vm1233_vm3, %v1822_v43  ;;  %1283 = vst.msk [vmem:[%s3068_s2 + $0xc4] sm:$0xf] %vm1233_vm3, %v1820_v50  ;;  %v1825_v59 = vpack.c.bf16 %v2843_v44, %v2843_v44  ;;  %v1823_v4 = vpack.c.bf16 %v2855_v20, %v2855_v20  ;;  %v1578_v40 = vsel %vm18_vm0, %v1473_v8, 0.0 }
 0x141   :  { %v1378_v39 = vadd.f32 %v1377_v32, %v1376_v1  ;;  %v1383_v52 = vsel %vm18_vm0, %v2675_v25, 0.0  ;;  %v1385_v62 = vsel %vm18_vm0, %v957_v51, 0.0  ;;  %v1826_v14 = vpack.c.bf16 %v2863_v63, %v2863_v63  ;;  %v2894_v25 = vld [vmem:[#allocation2 + $0x1c0] sm:$0xff]  ;;  %v2908_v51 = vld [vmem:[#allocation2 + $0x1d8] sm:$0xff] }
 0x142   :  { %v1573_v10 = vadd.f32 %v1572_v3, %v1571_v22  ;;  %1288 = vst.msk [vmem:[%s3068_s2 + $0xd8] sm:$0xf] %vm1233_vm3, %v1825_v59  ;;  %1286 = vst.msk [vmem:[%s3068_s2 + $0xd0] sm:$0xf] %vm1233_vm3, %v1823_v4  ;;  %v1580_v53 = vsel %vm18_vm0, %v1474_v54, 0.0  ;;  %v1582_v6 = vsel %vm18_vm0, %v1475_v9, 0.0  ;;  %v1476_v23 = vmul.f32 %v2793_v36, %v2793_v36 }
 0x143   :  { %v1380_v56 = vadd.f32 %v1379_v17, %v1378_v39  ;;  %1289 = vst.msk [vmem:[%s3068_s2 + $0xdc] sm:$0xf] %vm1233_vm3, %v1826_v14  ;;  %v1824_v31 = vpack.c.bf16 %v2876_v13, %v2876_v13  ;;  %v1829_v26 = vpack.c.bf16 %v2888_v16, %v2888_v16  ;;  %v1477_v5 = vmul.f32 %v2701_v33, %v2701_v33  ;;  %v2943_v32 = vld [vmem:[#allocation2 + $0x1e0] sm:$0xff] }
 0x144   :  { %v1575_v49 = vadd.f32 %v1574_v35, %v1573_v10  ;;  %v1387_v30 = vsel %vm18_vm0, %v2793_v36, 0.0  ;;  %v1827_v61 = vpack.c.bf16 %v2894_v25, %v2894_v25  ;;  %v1389_v48 = vsel %vm18_vm0, %v2701_v33, 0.0  ;;  %v2928_v36 = vld [vmem:[#allocation2 + $0x1f0] sm:$0xff]  ;;  %v2956_v35 = vld [vmem:[#allocation2 + $0x1f8] sm:$0xff] }
 0x145   :  { %v1382_v38 = vadd.f32 %v1381_v47, %v1380_v56  ;;  %1287 = vst.msk [vmem:[%s3068_s2 + $0xd4] sm:$0xf] %vm1233_vm3, %v1824_v31  ;;  %1292 = vst.msk [vmem:[%s3068_s2 + $0xe8] sm:$0xf] %vm1233_vm3, %v1829_v26  ;;  %v1478_v42 = vmul.f32 %v2791_v21, %v2791_v21  ;;  %v1584_v18 = vsel %vm18_vm0, %v1476_v23, 0.0  ;;  %v1479_v24 = vmul.f32 %v2810_v60, %v2810_v60 }
 0x146   :  { %v1577_v15 = vadd.f32 %v1576_v55, %v1575_v49  ;;  %1290 = vst.msk [vmem:[%s3068_s2 + $0xe0] sm:$0xf] %vm1233_vm3, %v1827_v61  ;;  %v1830_v33 = vpack.c.bf16 %v2908_v51, %v2908_v51  ;;  %v1828_v45 = vpack.c.bf16 %v2920_v41, %v2920_v41  ;;  %v1586_v57 = vsel %vm18_vm0, %v1477_v5, 0.0 }
 0x147   :  { %v1384_v0 = vadd.f32 %v1383_v52, %v1382_v38  ;;  %v1391_v22 = vsel %vm18_vm0, %v2791_v21, 0.0  ;;  %v1393_v1 = vsel %vm18_vm0, %v2810_v60, 0.0  ;;  %v1833_v3 = vpack.c.bf16 %v2928_v36, %v2928_v36  ;;  %v2962_v21 = vld [vmem:[#allocation2 + $0x1e8] sm:$0xff] }
 0x148   :  { %v1579_v28 = vadd.f32 %v1578_v40, %v1577_v15  ;;  %1293 = vst.msk [vmem:[%s3068_s2 + $0xec] sm:$0xf] %vm1233_vm3, %v1830_v33  ;;  %1291 = vst.msk [vmem:[%s3068_s2 + $0xe4] sm:$0xf] %vm1233_vm3, %v1828_v45  ;;  %v1588_v60 = vsel %vm18_vm0, %v1478_v42, 0.0  ;;  %v1590_v39 = vsel %vm18_vm0, %v1479_v24, 0.0  ;;  %v1480_v10 = vmul.f32 %v2829_v27, %v2829_v27 }
 0x149   :  { %v1386_v29 = vadd.f32 %v1385_v62, %v1384_v0  ;;  %1296 = vst.msk [vmem:[%s3068_s2 + $0xf8] sm:$0xf] %vm1233_vm3, %v1833_v3  ;;  %v1831_v43 = vpack.c.bf16 %v2943_v32, %v2943_v32  ;;  %v1834_v50 = vpack.c.bf16 %v2956_v35, %v2956_v35  ;;  %v1481_v47 = vmul.f32 %v2795_v2, %v2795_v2 }
 0x14a   :  { %v1581_v11 = vadd.f32 %v1580_v53, %v1579_v28  ;;  %v1395_v49 = vsel %vm18_vm0, %v2829_v27, 0.0  ;;  %v1832_v56 = vpack.c.bf16 %v2962_v21, %v2962_v21  ;;  %v1397_v9 = vsel %vm18_vm0, %v2795_v2, 0.0 }
 0x14b   :  { %v1388_v12 = vadd.f32 %v1387_v30, %v1386_v29  ;;  %1294 = vst.msk [vmem:[%s3068_s2 + $0xf0] sm:$0xf] %vm1233_vm3, %v1831_v43  ;;  %1297 = vst.msk [vmem:[%s3068_s2 + $0xfc] sm:$0xf] %vm1233_vm3, %v1834_v50  ;;  %v1482_v27 = vmul.f32 %v2823_v34, %v2823_v34  ;;  %v1592_v59 = vsel %vm18_vm0, %v1480_v10, 0.0  ;;  %v1483_v38 = vmul.f32 %v2855_v20, %v2855_v20 }
 0x14c   :  { %v1583_v7 = vadd.f32 %v1582_v6, %v1581_v11  ;;  %1295 = vst.msk [vmem:[%s3068_s2 + $0xf4] sm:$0xf] %vm1233_vm3, %v1832_v56  ;;  %v1594_v40 = vsel %vm18_vm0, %v1481_v47, 0.0  ;;  %v1399_v2 = vsel %vm18_vm0, %v2823_v34, 0.0  ;;  %v1401_v52 = vsel %vm18_vm0, %v2855_v20, 0.0 }
 0x14d   :  { %v1390_v58 = vadd.f32 %v1389_v48, %v1388_v12  ;;  %v1596_v28 = vsel %vm18_vm0, %v1482_v27, 0.0  ;;  %v1598_v0 = vsel %vm18_vm0, %v1483_v38, 0.0  ;;  %v1484_v53 = vmul.f32 %v2876_v13, %v2876_v13 }
 0x14e   :  { %v1585_v46 = vadd.f32 %v1584_v18, %v1583_v7  ;;  %v1485_v31 = vmul.f32 %v2843_v44, %v2843_v44  ;;  %v1403_v34 = vsel %vm18_vm0, %v2876_v13, 0.0  ;;  %v1405_v20 = vsel %vm18_vm0, %v2843_v44, 0.0 }
 0x14f   :  { %v1392_v19 = vadd.f32 %v1391_v22, %v1390_v58  ;;  %v1486_v26 = vmul.f32 %v2863_v63, %v2863_v63  ;;  %v1600_v5 = vsel %vm18_vm0, %v1484_v53, 0.0  ;;  %v1487_v30 = vmul.f32 %v2894_v25, %v2894_v25 }
 0x150   :  { %v1587_v37 = vadd.f32 %v1586_v57, %v1585_v46  ;;  %v1602_v7 = vsel %vm18_vm0, %v1485_v31, 0.0  ;;  %v1407_v13 = vsel %vm18_vm0, %v2863_v63, 0.0  ;;  %v1409_v12 = vsel %vm18_vm0, %v2894_v25, 0.0 }
 0x151   :  { %v1394_v8 = vadd.f32 %v1393_v1, %v1392_v19  ;;  %v1604_v18 = vsel %vm18_vm0, %v1486_v26, 0.0  ;;  %v1606_v24 = vsel %vm18_vm0, %v1487_v30, 0.0  ;;  %v1488_v33 = vmul.f32 %v2920_v41, %v2920_v41 }
 0x152   :  { %v1589_v17 = vadd.f32 %v1588_v60, %v1587_v37  ;;  %v1489_v45 = vmul.f32 %v2888_v16, %v2888_v16  ;;  %v1411_v63 = vsel %vm18_vm0, %v2920_v41, 0.0  ;;  %v1413_v25 = vsel %vm18_vm0, %v2888_v16, 0.0 }
 0x153   :  { %v1396_v55 = vadd.f32 %v1395_v49, %v1394_v8  ;;  %v1490_v1 = vmul.f32 %v2908_v51, %v2908_v51  ;;  %v1608_v3 = vsel %vm18_vm0, %v1488_v33, 0.0  ;;  %v1491_v37 = vmul.f32 %v2943_v32, %v2943_v32 }
 0x154   :  { %v1591_v54 = vadd.f32 %v1590_v39, %v1589_v17  ;;  %v1610_v39 = vsel %vm18_vm0, %v1489_v45, 0.0  ;;  %v1415_v41 = vsel %vm18_vm0, %v2908_v51, 0.0  ;;  %v1417_v10 = vsel %vm18_vm0, %v2943_v32, 0.0 }
 0x155   :  { %v1398_v15 = vadd.f32 %v1397_v9, %v1396_v55  ;;  %v1612_v8 = vsel %vm18_vm0, %v1490_v1, 0.0  ;;  %v1614_v17 = vsel %vm18_vm0, %v1491_v37, 0.0  ;;  %v1492_v50 = vmul.f32 %v2962_v21, %v2962_v21 }
 0x156   :  { %v1593_v4 = vadd.f32 %v1592_v59, %v1591_v54  ;;  %v1493_v56 = vmul.f32 %v2928_v36, %v2928_v36  ;;  %v1419_v51 = vsel %vm18_vm0, %v2962_v21, 0.0  ;;  %v1421_v32 = vsel %vm18_vm0, %v2928_v36, 0.0 }
 0x157   :  { %v1400_v14 = vadd.f32 %v1399_v2, %v1398_v15  ;;  %v1494_v9 = vmul.f32 %v2956_v35, %v2956_v35  ;;  %v1616_v27 = vsel %vm18_vm0, %v1492_v50, 0.0 }
 0x158   :  { %v1595_v62 = vadd.f32 %v1594_v40, %v1593_v4  ;;  %v1618_v15 = vsel %vm18_vm0, %v1493_v56, 0.0  ;;  %v1423_v4 = vsel %vm18_vm0, %v2956_v35, 0.0 }
 0x159   :  { %v1402_v6 = vadd.f32 %v1401_v52, %v1400_v14  ;;  %v1620_v21 = vsel %vm18_vm0, %v1494_v9, 0.0 }
 0x15a   :  { %v1597_v23 = vadd.f32 %v1596_v28, %v1595_v62 }
 0x15b   :  { %v1404_v11 = vadd.f32 %v1403_v34, %v1402_v6 }
 0x15c   :  { %v1599_v29 = vadd.f32 %v1598_v0, %v1597_v23 }
 0x15d   :  { %v1406_v61 = vadd.f32 %v1405_v20, %v1404_v11 }
 0x15e   :  { %v1601_v48 = vadd.f32 %v1600_v5, %v1599_v29 }
 0x15f   :  { %v1408_v44 = vadd.f32 %v1407_v13, %v1406_v61 }
 0x160   :  { %v1603_v42 = vadd.f32 %v1602_v7, %v1601_v48 }
 0x161   :  { %v1410_v58 = vadd.f32 %v1409_v12, %v1408_v44 }
 0x162   :  { %v1605_v46 = vadd.f32 %v1604_v18, %v1603_v42 }
 0x163   :  { %v1412_v22 = vadd.f32 %v1411_v63, %v1410_v58 }
 0x164   :  { %v1607_v57 = vadd.f32 %v1606_v24, %v1605_v46 }
 0x165   :  { %v1414_v19 = vadd.f32 %v1413_v25, %v1412_v22 }
 0x166   :  { %v1609_v60 = vadd.f32 %v1608_v3, %v1607_v57 }
 0x167   :  { %v1416_v16 = vadd.f32 %v1415_v41, %v1414_v19 }
 0x168   :  { %v1611_v43 = vadd.f32 %v1610_v39, %v1609_v60 }
 0x169   :  { %v1418_v47 = vadd.f32 %v1417_v10, %v1416_v16 }
 0x16a   :  { %v1613_v49 = vadd.f32 %v1612_v8, %v1611_v43 }
 0x16b   :  { %v1420_v55 = vadd.f32 %v1419_v51, %v1418_v47 }
 0x16c   :  { %v1615_v54 = vadd.f32 %v1614_v17, %v1613_v49 }
 0x16d   :  { %v1422_v59 = vadd.f32 %v1421_v32, %v1420_v55 }
 0x16e   :  { %v1617_v38 = vadd.f32 %v1616_v27, %v1615_v54 }
 0x16f   :  { %v1424_v40 = vadd.f32 %v1423_v4, %v1422_v59 }
 0x170   :  { %v1619_v2 = vadd.f32 %v1618_v15, %v1617_v38 }
 0x171   :  { %v1425_v52 = vrot.slane %v1424_v40, 4 }
 0x172   :  { %v1621_v62 = vadd.f32 %v1620_v21, %v1619_v2 }
 0x173   :  { %v1426_v14 = vadd.f32 %v1425_v52, %v1424_v40 }
 0x174   :  { %v1622_v36 = vrot.slane %v1621_v62, 4 }
 0x175   :  { %v1427_v28 = vrot.slane %v1426_v14, 2 }
 0x176   :  { %v1623_v0 = vadd.f32 %v1622_v36, %v1621_v62 }
 0x177   :  { %v1428_v53 = vadd.f32 %v1427_v28, %v1426_v14 }
 0x178   :  { %v1624_v6 = vrot.slane %v1623_v0, 2 }
 0x179   :  { %v1429_v23 = vrot.slane %v1428_v53, 1 }
 0x17a   :  { %v1625_v31 = vadd.f32 %v1624_v6, %v1623_v0 }
 0x17b   :  { %v1430_v29 = vadd.f32 %v1429_v23, %v1428_v53 }
 0x17c   :  { %v1626_v34 = vrot.slane %v1625_v31, 1 }
 0x17e   :  { %v1627_v11 = vadd.f32 %v1626_v34, %v1625_v31 }
 0x180   :  { %v1629_v35 = vsel %vm1628_vm4, %v1430_v29, %v1627_v11 }
 0x181   :  { %1631 = vst.msk [vmem:[%s3069_s3] sm:$0x3] %vm1630_vm5, %v1629_v35 }

</bundles_post_ra>
